<compile_context>
chip_gen: v5e
topology: v5e:2x2
jax: 0.10.0
libtpu: 0.0.40
codegen_flags: <defaults>
</compile_context>

<pallas_src>
import math

import jax
import jax.numpy as jnp
from jax.experimental import pallas as pl
from jax.experimental.pallas import tpu as pltpu


def _round_up(x, m):
    return (x + m - 1) // m * m


# ----------------------------------------------------------------------------
# Pallas kernel: grid = (batch_blocks, tq_tiles).
#   q_ref    : (Bb, Tq_tile, Cq3p)  bf16   (unfolded 3-tap query input, this Tq tile)
#   k_ref    : (Bb, Tk_p,   Ck3p)   bf16   (unfolded 3-tap key input, whole key axis)
#   mask_ref : (Bb, 1, Tk_p)        int32
#   key_sc   : (Bb, Tk_p, A)        f32    persistent VMEM scratch (key conv output)
# ----------------------------------------------------------------------------
def aligner_kernel(q_ref, k_ref, mask_ref,
                   wq1_ref, bq1_ref, wq2_ref, bq2_ref, wq3_ref, bq3_ref,
                   wk1_ref, bk1_ref, wk2_ref, bk2_ref,
                   attn_ref, logp_ref, key_sc):
    Bb, Tqt, Cq3p = q_ref.shape
    _, Tk, Ck3p = k_ref.shape
    A = key_sc.shape[-1]

    def mm(x_bf16, w_ref, b_ref):
        # bf16 x bf16 -> f32 accumulation on the MXU, f32 bias add.
        return (jnp.dot(x_bf16, w_ref[...], preferred_element_type=jnp.float32)
                + b_ref[...])

    # ---- key path: Conv1d(k=3) -> ReLU -> Conv1d(k=1), once per batch block ----
    @pl.when(pl.program_id(1) == 0)
    def _():
        k2d = k_ref[...].reshape(Bb * Tk, Ck3p)
        kh = jnp.maximum(mm(k2d, wk1_ref, bk1_ref), 0.0).astype(jnp.bfloat16)
        key_sc[...] = mm(kh, wk2_ref, bk2_ref).reshape(Bb, Tk, A)      # f32

    # ---- query path for this Tq tile: Conv1d(k=3) -> ReLU -> Conv1d(k=1) -> ReLU -> Conv1d(k=1) ----
    q2d = q_ref[...].reshape(Bb * Tqt, Cq3p)
    qh = jnp.maximum(mm(q2d, wq1_ref, bq1_ref), 0.0).astype(jnp.bfloat16)
    qh = jnp.maximum(mm(qh, wq2_ref, bq2_ref), 0.0).astype(jnp.bfloat16)
    query_out = mm(qh, wq3_ref, bq3_ref).reshape(Bb, Tqt, A)           # f32

    ko = key_sc[...]                                                   # (Bb, Tk, A) f32

    # ---- batched cdist (p=2) via the Gram identity, contraction on the last axes ----
    qq = jnp.sum(query_out * query_out, axis=-1, keepdims=True)        # (Bb, Tqt, 1)
    kk = jnp.sum(ko * ko, axis=-1)[:, None, :]                         # (Bb, 1, Tk)
    gram = jnp.einsum('bqa,bka->bqk', query_out, ko,
                      preferred_element_type=jnp.float32)              # (Bb, Tqt, Tk)
    dist = jnp.sqrt(jnp.maximum(qq + kk - 2.0 * gram, 0.0))

    # mask fill (module semantics: the returned logp is masked too).
    neg = jnp.float32(-jnp.finfo(logp_ref.dtype).max)
    m = mask_ref[...] != 0                                             # (Bb, 1, Tk)
    logp = jnp.where(m, dist, neg)

    # softmax over the (padded, masked) key axis; batched, f32.
    row_max = jnp.max(logp, axis=-1, keepdims=True)
    e = jnp.exp(logp - row_max)
    denom = jnp.sum(e, axis=-1, keepdims=True)
    attn = e * pl.reciprocal(denom, approx=True)

    logp_ref[...] = logp.astype(logp_ref.dtype)
    attn_ref[...] = attn.astype(attn_ref.dtype)


# ----------------------------------------------------------------------------
# Wrapper: layout / weight plumbing, tiling selection, pallas_call
# ----------------------------------------------------------------------------
def aligner_forward(queries, keys, mask, params, *,
                    out_dtype=jnp.float32,
                    block_b=None, tq_tile=None, vmem_limit_bytes=None):
    """queries: (B, dim_in, Tq), keys: (B, dim_hidden, Tk), mask: (B, Tk) bool/int.

    Returns (attn, attn_logp), each (B, 1, Tq, Tk) in `out_dtype` (module's output format).
    `out_dtype=jnp.bfloat16` halves the HBM writeback if downstream tolerates it.
    """
    B, Cq, Tq = queries.shape
    _, Ck, Tk = keys.shape
    A = params['wq3'].shape[0]

    # Lane/sublane friendly padding.
    Tk_p = _round_up(Tk, 128)                       # output lane axis -> mult of 128
    Tq8 = _round_up(Tq, 8)
    Cq3p = _round_up(3 * Cq, 128)                   # lane-dense unfolded contraction dims
    Ck3p = _round_up(3 * Ck, 128)
    out_itemsize = jnp.dtype(out_dtype).itemsize

    # --- VMEM budget: pick the biggest block that fits, pass an explicit limit ---
    if vmem_limit_bytes is None:
        try:
            cap = int(pltpu.get_tpu_info().vmem_capacity_bytes)
        except Exception:
            cap = 64 << 20                          # conservative (v7x physical)
        vmem_limit_bytes = cap * 3 // 4
    budget = int(vmem_limit_bytes * 0.8)

    def footprint(bb, tt):
        in_q = 2 * bb * tt * Cq3p * 2               # bf16 query block, double-buffered
        in_k = 2 * bb * Tk_p * Ck3p * 2             # bf16 key block (resident, 2 bufs)
        in_m = 2 * bb * Tk_p * 4                    # int32 mask
        outs = 2 * 2 * bb * tt * Tk_p * out_itemsize  # 2 outputs x 2 buffers
        key_sc = bb * Tk_p * A * 4                  # persistent key_out scratch (f32)
        work = bb * tt * Tk_p * 4 + 4 * bb * (tt * Cq3p + Tk_p * Ck3p)  # rough working set
        return in_q + in_k + in_m + outs + key_sc + work

    if tq_tile is None:
        tq_tile = min(Tq8, 256)
    if block_b is None:
        block_b = min(B, max(1, -(-128 // Tq8)))    # fill >=128 MXU rows per conv matmul
        if B >= 2:
            block_b = min(block_b, max(1, B // 2))  # >=2 steps on the parallel axis (v7x 2 TCs)
    # Shrink under the VMEM budget: batch packing first, then the Tq tile.
    while footprint(block_b, tq_tile) > budget and (block_b > 1 or tq_tile > 8):
        if block_b > 1:
            block_b = max(1, block_b // 2)
        else:
            tq_tile = max(8, _round_up(tq_tile // 2, 8))

    Tq_p = _round_up(Tq, tq_tile)
    B_p = _round_up(B, block_b)
    grid = (B_p // block_b, Tq_p // tq_tile)

    # --- layout plumbing: (B, C, T) -> (B_p, T_pad, 3C_pad) bf16, zero conv boundaries ---
    def to_btc(x, T, T_pad):
        x = jnp.swapaxes(x, 1, 2).astype(jnp.float32)                  # (B, T, C)
        return jnp.pad(x, ((0, B_p - B), (0, T_pad - T), (0, 0)))

    def unfold3(x, C3p):
        # (B, T, C) -> (B, T, 3C_pad): columns [x[t-1], x[t], x[t+1]] with zero boundaries,
        # so Conv1d(kernel=3, padding=1) becomes a single matmul; pad contraction to 128.
        zero = jnp.zeros_like(x[:, :1])
        x_prev = jnp.concatenate([zero, x[:, :-1]], axis=1)
        x_next = jnp.concatenate([x[:, 1:], zero], axis=1)
        u = jnp.concatenate([x_prev, x, x_next], axis=-1)
        return jnp.pad(u, ((0, 0), (0, 0), (0, C3p - u.shape[-1])))

    q_unf = unfold3(to_btc(queries, Tq, Tq_p), Cq3p).astype(jnp.bfloat16)   # (B_p, Tq_p, Cq3p)
    k_unf = unfold3(to_btc(keys, Tk, Tk_p), Ck3p).astype(jnp.bfloat16)      # (B_p, Tk_p, Ck3p)

    mask_p = jnp.pad(mask.astype(jnp.int32), ((0, B_p - B), (0, Tk_p - Tk)))
    mask_p = mask_p[:, None, :]                                             # (B_p, 1, Tk_p)

    # --- weights: PyTorch Conv1d (Cout, Cin, K) -> matmul form (bf16), f32 biases ---
    bf16 = jnp.bfloat16
    wq1 = jnp.transpose(params['wq1'], (2, 1, 0)).reshape(3 * Cq, 2 * Cq)
    wq1 = jnp.pad(wq1, ((0, Cq3p - 3 * Cq), (0, 0))).astype(bf16)           # (Cq3p, 2Cq)
    wk1 = jnp.transpose(params['wk1'], (2, 1, 0)).reshape(3 * Ck, 2 * Ck)
    wk1 = jnp.pad(wk1, ((0, Ck3p - 3 * Ck), (0, 0))).astype(bf16)           # (Ck3p, 2Ck)
    wq2 = params['wq2'][:, :, 0].T.astype(bf16)                             # (2Cq, Cq)
    wq3 = params['wq3'][:, :, 0].T.astype(bf16)                             # (Cq, A)
    wk2 = params['wk2'][:, :, 0].T.astype(bf16)                             # (2Ck, A)
    bq1 = params['bq1'][None, :].astype(jnp.float32)
    bq2 = params['bq2'][None, :].astype(jnp.float32)
    bq3 = params['bq3'][None, :].astype(jnp.float32)
    bk1 = params['bk1'][None, :].astype(jnp.float32)
    bk2 = params['bk2'][None, :].astype(jnp.float32)

    def full(arr):
        n = arr.ndim
        return pl.BlockSpec(arr.shape, lambda b, t, _n=n: (0,) * _n)

    grid_spec = pltpu.PrefetchScalarGridSpec(
        num_scalar_prefetch=0,
        grid=grid,
        in_specs=[
            pl.BlockSpec((block_b, tq_tile, Cq3p), lambda b, t: (b, t, 0)),
            pl.BlockSpec((block_b, Tk_p, Ck3p), lambda b, t: (b, 0, 0)),   # resident over Tq axis
            pl.BlockSpec((block_b, 1, Tk_p), lambda b, t: (b, 0, 0)),
            full(wq1), full(bq1), full(wq2), full(bq2), full(wq3), full(bq3),
            full(wk1), full(bk1), full(wk2), full(bk2),
        ],
        out_specs=[
            pl.BlockSpec((block_b, tq_tile, Tk_p), lambda b, t: (b, t, 0)),
            pl.BlockSpec((block_b, tq_tile, Tk_p), lambda b, t: (b, t, 0)),
        ],
        scratch_shapes=[pltpu.VMEM((block_b, Tk_p, A), jnp.float32)],       # persistent key_out
    )

    attn_f, logp_f = pl.pallas_call(
        aligner_kernel,
        out_shape=(jax.ShapeDtypeStruct((B_p, Tq_p, Tk_p), out_dtype),
                   jax.ShapeDtypeStruct((B_p, Tq_p, Tk_p), out_dtype)),
        grid_spec=grid_spec,
        compiler_params=pltpu.CompilerParams(
            dimension_semantics=("parallel", "arbitrary"),
            vmem_limit_bytes=int(vmem_limit_bytes)),
    )(q_unf, k_unf, mask_p, wq1, bq1, wq2, bq2, wq3, bq3, wk1, bk1, wk2, bk2)

    attn = attn_f[:B, :Tq, :Tk][:, None]       # (B, 1, Tq, Tk)
    logp = logp_f[:B, :Tq, :Tk][:, None]
    return attn, logp


# ----------------------------------------------------------------------------
# Deterministic parameter init (PyTorch Conv1d default: U(-1/sqrt(fan_in*k), ...))
# ----------------------------------------------------------------------------
def init_params(key, dim_in, dim_hidden, attn_channels):
    def conv_init(k, cout, cin, ksize):
        k1, k2 = jax.random.split(k)
        bound = 1.0 / math.sqrt(cin * ksize)
        w = jax.random.uniform(k1, (cout, cin, ksize), jnp.float32, -bound, bound)
        b = jax.random.uniform(k2, (cout,), jnp.float32, -bound, bound)
        return w, b

    ks = jax.random.split(key, 5)
    p = {}
    p['wk1'], p['bk1'] = conv_init(ks[0], dim_hidden * 2, dim_hidden, 3)
    p['wk2'], p['bk2'] = conv_init(ks[1], attn_channels, dim_hidden * 2, 1)
    p['wq1'], p['bq1'] = conv_init(ks[2], dim_in * 2, dim_in, 3)
    p['wq2'], p['bq2'] = conv_init(ks[3], dim_in, dim_in * 2, 1)
    p['wq3'], p['bq3'] = conv_init(ks[4], attn_channels, dim_in, 1)
    return p


# ----------------------------------------------------------------------------
# Pure-JAX reference (independent path: lax.conv + explicit pairwise distance),
# same precision policy as the kernel: bf16 conv inputs, f32 accumulation.
# ----------------------------------------------------------------------------
def reference_forward(queries, keys, mask, p):
    bf16, f32 = jnp.bfloat16, jnp.float32

    def conv1d(x, w, b, pad):
        y = jax.lax.conv_general_dilated(
            x.astype(bf16), w.astype(bf16),
            window_strides=(1,), padding=[(pad, pad)],
            dimension_numbers=('NCH', 'OIH', 'NCH'),
            preferred_element_type=f32)
        return y + b[None, :, None].astype(f32)

    k = conv1d(keys.astype(f32), p['wk1'], p['bk1'], 1)
    k = jnp.maximum(k, 0.0)
    k = conv1d(k, p['wk2'], p['bk2'], 0)

    q = conv1d(queries.astype(f32), p['wq1'], p['bq1'], 1)
    q = jnp.maximum(q, 0.0)
    q = conv1d(q, p['wq2'], p['bq2'], 0)
    q = jnp.maximum(q, 0.0)
    q = conv1d(q, p['wq3'], p['bq3'], 0)

    ko = jnp.swapaxes(k, 1, 2)       # (B, Tk, A)
    qo = jnp.swapaxes(q, 1, 2)       # (B, Tq, A)
    dist = jnp.sqrt(jnp.sum((qo[:, :, None, :] - ko[:, None, :, :]) ** 2, axis=-1))
    logp = dist[:, None]                                           # (B, 1, Tq, Tk)
    m = mask[:, None, None, :].astype(bool)
    logp = jnp.where(m, logp, -jnp.finfo(jnp.float32).max)
    attn = jax.nn.softmax(logp, axis=-1)
    return attn, logp


if __name__ == "__main__":
    # Small synthetic shapes consistent with the module's forward.
    B, DIM_IN, DIM_HIDDEN, ATTN_CH = 2, 32, 64, 32
    TQ, TK = 16, 24

    root = jax.random.PRNGKey(0)
    kp, kq, kk_, _ = jax.random.split(root, 4)

    params = init_params(kp, DIM_IN, DIM_HIDDEN, ATTN_CH)
    queries = jax.random.normal(kq, (B, DIM_IN, TQ), jnp.float32)   # (B, C, Tq) as in torch
    keys_in = jax.random.normal(kk_, (B, DIM_HIDDEN, TK), jnp.float32)

    lengths = jnp.array([TK, 18], dtype=jnp.int32)
    mask = (jnp.arange(TK)[None, :] < lengths[:, None])             # (B, Tk) bool

    attn, attn_logp = aligner_forward(queries, keys_in, mask, params)
    jax.block_until_ready((attn, attn_logp))

    ref_attn, ref_logp = reference_forward(queries, keys_in, mask, params)
    assert attn.shape == (B, 1, TQ, TK) and attn_logp.shape == (B, 1, TQ, TK)
    # bf16 matmul inputs (f32 accumulate) in both paths -> tolerances account for
    # bf16-cast rounding plus the approx reciprocal in the softmax.
    assert jnp.allclose(attn_logp, ref_logp, rtol=5e-3, atol=5e-3), \
        float(jnp.max(jnp.abs(attn_logp - ref_logp)))
    assert jnp.allclose(attn, ref_attn, rtol=2e-2, atol=1e-4), \
        float(jnp.max(jnp.abs(attn - ref_attn)))

    print("KERNEL_OK")
</pallas_src>

<mosaic_0001>
module attributes {stable_mosaic.version = 11 : i64} {
  func.func @aligner_kernel(%arg0: i32, %arg1: i32, %arg2: memref<1x16x128xbf16, #tpu.memory_space<vmem>>, %arg3: memref<1x128x256xbf16, #tpu.memory_space<vmem>>, %arg4: memref<1x1x128xi32, #tpu.memory_space<vmem>>, %arg5: memref<128x64xbf16, #tpu.memory_space<vmem>>, %arg6: memref<1x64xf32, #tpu.memory_space<vmem>>, %arg7: memref<64x32xbf16, #tpu.memory_space<vmem>>, %arg8: memref<1x32xf32, #tpu.memory_space<vmem>>, %arg9: memref<32x32xbf16, #tpu.memory_space<vmem>>, %arg10: memref<1x32xf32, #tpu.memory_space<vmem>>, %arg11: memref<256x128xbf16, #tpu.memory_space<vmem>>, %arg12: memref<1x128xf32, #tpu.memory_space<vmem>>, %arg13: memref<128x32xbf16, #tpu.memory_space<vmem>>, %arg14: memref<1x32xf32, #tpu.memory_space<vmem>>, %arg15: memref<1x16x128xf32, #tpu.memory_space<vmem>>, %arg16: memref<1x16x128xf32, #tpu.memory_space<vmem>>, %arg17: memref<1x128x32xf32, #tpu.memory_space<vmem>>) attributes {dimension_semantics = [#tpu.dimension_semantics<parallel>, #tpu.dimension_semantics<arbitrary>], iteration_bounds = array<i64: 2, 1>, scalar_prefetch = 0 : i64, scratch_operands = 1 : i64, tpu.core_type = #tpu.core_type<tc>, window_params = [{transform_indices = @transform_0, window_bounds = array<i64: 1, 16, 128>}, {transform_indices = @transform_1, window_bounds = array<i64: 1, 128, 256>}, {transform_indices = @transform_2, window_bounds = array<i64: 1, 1, 128>}, {pipeline_mode = #tpu.pipeline_mode<synchronous>, transform_indices = @transform_3, window_bounds = array<i64: 128, 64>}, {pipeline_mode = #tpu.pipeline_mode<synchronous>, transform_indices = @transform_4, window_bounds = array<i64: 1, 64>}, {pipeline_mode = #tpu.pipeline_mode<synchronous>, transform_indices = @transform_5, window_bounds = array<i64: 64, 32>}, {pipeline_mode = #tpu.pipeline_mode<synchronous>, transform_indices = @transform_6, window_bounds = array<i64: 1, 32>}, {pipeline_mode = #tpu.pipeline_mode<synchronous>, transform_indices = @transform_7, window_bounds = array<i64: 32, 32>}, {pipeline_mode = #tpu.pipeline_mode<synchronous>, transform_indices = @transform_8, window_bounds = array<i64: 1, 32>}, {pipeline_mode = #tpu.pipeline_mode<synchronous>, transform_indices = @transform_9, window_bounds = array<i64: 256, 128>}, {pipeline_mode = #tpu.pipeline_mode<synchronous>, transform_indices = @transform_10, window_bounds = array<i64: 1, 128>}, {pipeline_mode = #tpu.pipeline_mode<synchronous>, transform_indices = @transform_11, window_bounds = array<i64: 128, 32>}, {pipeline_mode = #tpu.pipeline_mode<synchronous>, transform_indices = @transform_12, window_bounds = array<i64: 1, 32>}, {transform_indices = @transform_13, window_bounds = array<i64: 1, 16, 128>}, {transform_indices = @transform_14, window_bounds = array<i64: 1, 16, 128>}]} {
    %c0_i32 = arith.constant 0 : i32
    %0 = arith.cmpi eq, %arg1, %c0_i32 : i32
    %1 = arith.extui %0 : i1 to i32
    %c0_i32_0 = arith.constant 0 : i32
    %2 = arith.cmpi ne, %1, %c0_i32_0 : i32
    scf.if %2 {
      %c0_40 = arith.constant 0 : index
      %c0_41 = arith.constant 0 : index
      %c0_42 = arith.constant 0 : index
      %63 = vector.load %arg3[%c0_40, %c0_41, %c0_42] : memref<1x128x256xbf16, #tpu.memory_space<vmem>>, vector<1x128x256xbf16>
      %64 = vector.shape_cast %63 : vector<1x128x256xbf16> to vector<128x256xbf16>
      %c0_43 = arith.constant 0 : index
      %c0_44 = arith.constant 0 : index
      %65 = vector.load %arg11[%c0_43, %c0_44] : memref<256x128xbf16, #tpu.memory_space<vmem>>, vector<256x128xbf16>
      %cst_45 = arith.constant dense<0.000000e+00> : vector<128x128xf32>
      %66 = tpu.matmul %64, %65, %cst_45 {dimension_numbers = #tpu.dot_dimension_numbers<[1], [0], [0], [1], [0, 0, 1, 1], [], []>} : vector<128x256xbf16>, vector<256x128xbf16>, vector<128x128xf32> -> vector<128x128xf32>
      %c0_46 = arith.constant 0 : index
      %c0_47 = arith.constant 0 : index
      %67 = vector.load %arg12[%c0_46, %c0_47] : memref<1x128xf32, #tpu.memory_space<vmem>>, vector<1x128xf32>
      %68 = vector.broadcast %67 : vector<1x128xf32> to vector<128x128xf32>
      %69 = arith.addf %66, %68 : vector<128x128xf32>
      %cst_48 = arith.constant 0.000000e+00 : f32
      %70 = vector.broadcast %cst_48 : f32 to vector<128x128xf32>
      %71 = arith.maximumf %69, %70 : vector<128x128xf32>
      %72 = arith.truncf %71 : vector<128x128xf32> to vector<128x128xbf16>
      %c0_49 = arith.constant 0 : index
      %c0_50 = arith.constant 0 : index
      %73 = vector.load %arg13[%c0_49, %c0_50] : memref<128x32xbf16, #tpu.memory_space<vmem>>, vector<128x32xbf16>
      %cst_51 = arith.constant dense<0.000000e+00> : vector<128x32xf32>
      %74 = tpu.matmul %72, %73, %cst_51 {dimension_numbers = #tpu.dot_dimension_numbers<[1], [0], [0], [1], [0, 0, 1, 1], [], []>} : vector<128x128xbf16>, vector<128x32xbf16>, vector<128x32xf32> -> vector<128x32xf32>
      %c0_52 = arith.constant 0 : index
      %c0_53 = arith.constant 0 : index
      %75 = vector.load %arg14[%c0_52, %c0_53] : memref<1x32xf32, #tpu.memory_space<vmem>>, vector<1x32xf32>
      %76 = vector.broadcast %75 : vector<1x32xf32> to vector<128x32xf32>
      %77 = arith.addf %74, %76 : vector<128x32xf32>
      %78 = vector.shape_cast %77 : vector<128x32xf32> to vector<1x128x32xf32>
      %c0_54 = arith.constant 0 : index
      %c0_55 = arith.constant 0 : index
      %c0_56 = arith.constant 0 : index
      %79 = vector.load %arg17[%c0_54, %c0_55, %c0_56] : memref<1x128x32xf32, #tpu.memory_space<vmem>>, vector<1x128x32xf32>
      tpu.vector_store %arg17[%c0_54, %c0_55, %c0_56], %78 {strides = array<i32>} : memref<1x128x32xf32, #tpu.memory_space<vmem>>, vector<1x128x32xf32>,
    } else {
    }
    %c0 = arith.constant 0 : index
    %c0_1 = arith.constant 0 : index
    %c0_2 = arith.constant 0 : index
    %3 = vector.load %arg2[%c0, %c0_1, %c0_2] : memref<1x16x128xbf16, #tpu.memory_space<vmem>>, vector<1x16x128xbf16>
    %4 = vector.shape_cast %3 : vector<1x16x128xbf16> to vector<16x128xbf16>
    %c0_3 = arith.constant 0 : index
    %c0_4 = arith.constant 0 : index
    %5 = vector.load %arg5[%c0_3, %c0_4] : memref<128x64xbf16, #tpu.memory_space<vmem>>, vector<128x64xbf16>
    %cst = arith.constant dense<0.000000e+00> : vector<16x64xf32>
    %6 = tpu.matmul %4, %5, %cst {dimension_numbers = #tpu.dot_dimension_numbers<[1], [0], [0], [1], [0, 0, 1, 1], [], []>} : vector<16x128xbf16>, vector<128x64xbf16>, vector<16x64xf32> -> vector<16x64xf32>
    %c0_5 = arith.constant 0 : index
    %c0_6 = arith.constant 0 : index
    %7 = vector.load %arg6[%c0_5, %c0_6] : memref<1x64xf32, #tpu.memory_space<vmem>>, vector<1x64xf32>
    %8 = vector.broadcast %7 : vector<1x64xf32> to vector<16x64xf32>
    %9 = arith.addf %6, %8 : vector<16x64xf32>
    %cst_7 = arith.constant 0.000000e+00 : f32
    %10 = vector.broadcast %cst_7 : f32 to vector<16x64xf32>
    %11 = arith.maximumf %9, %10 : vector<16x64xf32>
    %12 = arith.truncf %11 : vector<16x64xf32> to vector<16x64xbf16>
    %c0_8 = arith.constant 0 : index
    %c0_9 = arith.constant 0 : index
    %13 = vector.load %arg7[%c0_8, %c0_9] : memref<64x32xbf16, #tpu.memory_space<vmem>>, vector<64x32xbf16>
    %cst_10 = arith.constant dense<0.000000e+00> : vector<16x32xf32>
    %14 = tpu.matmul %12, %13, %cst_10 {dimension_numbers = #tpu.dot_dimension_numbers<[1], [0], [0], [1], [0, 0, 1, 1], [], []>} : vector<16x64xbf16>, vector<64x32xbf16>, vector<16x32xf32> -> vector<16x32xf32>
    %c0_11 = arith.constant 0 : index
    %c0_12 = arith.constant 0 : index
    %15 = vector.load %arg8[%c0_11, %c0_12] : memref<1x32xf32, #tpu.memory_space<vmem>>, vector<1x32xf32>
    %16 = vector.broadcast %15 : vector<1x32xf32> to vector<16x32xf32>
    %17 = arith.addf %14, %16 : vector<16x32xf32>
    %cst_13 = arith.constant 0.000000e+00 : f32
    %18 = vector.broadcast %cst_13 : f32 to vector<16x32xf32>
    %19 = arith.maximumf %17, %18 : vector<16x32xf32>
    %20 = arith.truncf %19 : vector<16x32xf32> to vector<16x32xbf16>
    %c0_14 = arith.constant 0 : index
    %c0_15 = arith.constant 0 : index
    %21 = vector.load %arg9[%c0_14, %c0_15] : memref<32x32xbf16, #tpu.memory_space<vmem>>, vector<32x32xbf16>
    %cst_16 = arith.constant dense<0.000000e+00> : vector<16x32xf32>
    %22 = tpu.matmul %20, %21, %cst_16 {dimension_numbers = #tpu.dot_dimension_numbers<[1], [0], [0], [1], [0, 0, 1, 1], [], []>} : vector<16x32xbf16>, vector<32x32xbf16>, vector<16x32xf32> -> vector<16x32xf32>
    %c0_17 = arith.constant 0 : index
    %c0_18 = arith.constant 0 : index
    %23 = vector.load %arg10[%c0_17, %c0_18] : memref<1x32xf32, #tpu.memory_space<vmem>>, vector<1x32xf32>
    %24 = vector.broadcast %23 : vector<1x32xf32> to vector<16x32xf32>
    %25 = arith.addf %22, %24 : vector<16x32xf32>
    %26 = vector.shape_cast %25 : vector<16x32xf32> to vector<1x16x32xf32>
    %c0_19 = arith.constant 0 : index
    %c0_20 = arith.constant 0 : index
    %c0_21 = arith.constant 0 : index
    %27 = vector.load %arg17[%c0_19, %c0_20, %c0_21] : memref<1x128x32xf32, #tpu.memory_space<vmem>>, vector<1x128x32xf32>
    %28 = arith.mulf %26, %26 : vector<1x16x32xf32>
    %cst_22 = arith.constant dense<0.000000e+00> : vector<1x16xf32>
    %29 = vector.multi_reduction <add>, %28, %cst_22 [2] : vector<1x16x32xf32> to vector<1x16xf32>
    %30 = vector.shape_cast %29 : vector<1x16xf32> to vector<1x16x1xf32>
    %31 = arith.mulf %27, %27 : vector<1x128x32xf32>
    %cst_23 = arith.constant dense<0.000000e+00> : vector<1x128xf32>
    %32 = vector.multi_reduction <add>, %31, %cst_23 [2] : vector<1x128x32xf32> to vector<1x128xf32>
    %33 = vector.shape_cast %32 : vector<1x128xf32> to vector<1x1x128xf32>
    "tpu.trace_start"() <{level = 10 : i32, message = "bqa,bka->bqk"}> : () -> ()
    %cst_24 = arith.constant dense<0.000000e+00> : vector<1x16x128xf32>
    %34 = tpu.matmul %26, %27, %cst_24 {dimension_numbers = #tpu.dot_dimension_numbers<[2], [2], [1], [1], [0, 0, 0, 1, 1, 1], [0], [0]>} : vector<1x16x32xf32>, vector<1x128x32xf32>, vector<1x16x128xf32> -> vector<1x16x128xf32>
    "tpu.trace_stop"() : () -> ()
    %35 = vector.broadcast %30 : vector<1x16x1xf32> to vector<1x16x128xf32>
    %36 = vector.broadcast %33 : vector<1x1x128xf32> to vector<1x16x128xf32>
    %37 = arith.addf %35, %36 : vector<1x16x128xf32>
    %cst_25 = arith.constant 2.000000e+00 : f32
    %38 = vector.broadcast %cst_25 : f32 to vector<1x16x128xf32>
    %39 = arith.mulf %38, %34 : vector<1x16x128xf32>
    %40 = arith.subf %37, %39 : vector<1x16x128xf32>
    %cst_26 = arith.constant 0.000000e+00 : f32
    %41 = vector.broadcast %cst_26 : f32 to vector<1x16x128xf32>
    %42 = arith.maximumf %40, %41 : vector<1x16x128xf32>
    %43 = math.sqrt %42 : vector<1x16x128xf32>
    %c0_27 = arith.constant 0 : index
    %c0_28 = arith.constant 0 : index
    %c0_29 = arith.constant 0 : index
    %44 = vector.load %arg4[%c0_27, %c0_28, %c0_29] : memref<1x1x128xi32, #tpu.memory_space<vmem>>, vector<1x1x128xi32>
    %c0_i32_30 = arith.constant 0 : i32
    %45 = vector.broadcast %c0_i32_30 : i32 to vector<1x1x128xi32>
    %46 = arith.cmpi ne, %44, %45 : vector<1x1x128xi32>
    %cst_31 = arith.constant -3.40282347E+38 : f32
    %47 = vector.shape_cast %46 : vector<1x1x128xi1> to vector<1x1x128xi1>
    %48 = vector.broadcast %47 : vector<1x1x128xi1> to vector<1x16x128xi1>
    %49 = vector.broadcast %cst_31 : f32 to vector<1x16x128xf32>
    %50 = arith.select %48, %43, %49 : vector<1x16x128xi1>, vector<1x16x128xf32>
    %cst_32 = arith.constant dense<0xFF800000> : vector<1x16xf32>
    %51 = vector.multi_reduction <maximumf>, %50, %cst_32 [2] : vector<1x16x128xf32> to vector<1x16xf32>
    %52 = vector.shape_cast %51 : vector<1x16xf32> to vector<1x16x1xf32>
    %53 = vector.broadcast %52 : vector<1x16x1xf32> to vector<1x16x128xf32>
    %54 = arith.subf %50, %53 : vector<1x16x128xf32>
    %55 = math.exp %54 : vector<1x16x128xf32>
    %cst_33 = arith.constant dense<0.000000e+00> : vector<1x16xf32>
    %56 = vector.multi_reduction <add>, %55, %cst_33 [2] : vector<1x16x128xf32> to vector<1x16xf32>
    %57 = vector.shape_cast %56 : vector<1x16xf32> to vector<1x16x1xf32>
    %58 = tpu.reciprocal %57 {approx = true} : vector<1x16x1xf32> -> vector<1x16x1xf32>
    %59 = vector.broadcast %58 : vector<1x16x1xf32> to vector<1x16x128xf32>
    %60 = arith.mulf %55, %59 : vector<1x16x128xf32>
    %c0_34 = arith.constant 0 : index
    %c0_35 = arith.constant 0 : index
    %c0_36 = arith.constant 0 : index
    %61 = vector.load %arg16[%c0_34, %c0_35, %c0_36] : memref<1x16x128xf32, #tpu.memory_space<vmem>>, vector<1x16x128xf32>
    tpu.vector_store %arg16[%c0_34, %c0_35, %c0_36], %50 {strides = array<i32>} : memref<1x16x128xf32, #tpu.memory_space<vmem>>, vector<1x16x128xf32>,
    %c0_37 = arith.constant 0 : index
    %c0_38 = arith.constant 0 : index
    %c0_39 = arith.constant 0 : index
    %62 = vector.load %arg15[%c0_37, %c0_38, %c0_39] : memref<1x16x128xf32, #tpu.memory_space<vmem>>, vector<1x16x128xf32>
    tpu.vector_store %arg15[%c0_37, %c0_38, %c0_39], %60 {strides = array<i32>} : memref<1x16x128xf32, #tpu.memory_space<vmem>>, vector<1x16x128xf32>,
    return
  }
  func.func @transform_0(%arg0: i32, %arg1: i32) -> (i32, i32, i32) {
    %c0_i32 = arith.constant 0 : i32
    %c0_i32_0 = arith.constant 0 : i32
    return %arg0, %arg1, %c0_i32 : i32, i32, i32
  }
  func.func @transform_1(%arg0: i32, %arg1: i32) -> (i32, i32, i32) {
    %c0_i32 = arith.constant 0 : i32
    %c0_i32_0 = arith.constant 0 : i32
    %c0_i32_1 = arith.constant 0 : i32
    return %arg0, %c0_i32, %c0_i32_0 : i32, i32, i32
  }
  func.func @transform_2(%arg0: i32, %arg1: i32) -> (i32, i32, i32) {
    %c0_i32 = arith.constant 0 : i32
    %c0_i32_0 = arith.constant 0 : i32
    %c0_i32_1 = arith.constant 0 : i32
    return %arg0, %c0_i32, %c0_i32_0 : i32, i32, i32
  }
  func.func @transform_3(%arg0: i32, %arg1: i32) -> (i32, i32) {
    %c0_i32 = arith.constant 0 : i32
    %c0_i32_0 = arith.constant 0 : i32
    %c0_i32_1 = arith.constant 0 : i32
    return %c0_i32, %c0_i32_0 : i32, i32
  }
  func.func @transform_4(%arg0: i32, %arg1: i32) -> (i32, i32) {
    %c0_i32 = arith.constant 0 : i32
    %c0_i32_0 = arith.constant 0 : i32
    %c0_i32_1 = arith.constant 0 : i32
    return %c0_i32, %c0_i32_0 : i32, i32
  }
  func.func @transform_5(%arg0: i32, %arg1: i32) -> (i32, i32) {
    %c0_i32 = arith.constant 0 : i32
    %c0_i32_0 = arith.constant 0 : i32
    %c0_i32_1 = arith.constant 0 : i32
    return %c0_i32, %c0_i32_0 : i32, i32
  }
  func.func @transform_6(%arg0: i32, %arg1: i32) -> (i32, i32) {
    %c0_i32 = arith.constant 0 : i32
    %c0_i32_0 = arith.constant 0 : i32
    %c0_i32_1 = arith.constant 0 : i32
    return %c0_i32, %c0_i32_0 : i32, i32
  }
  func.func @transform_7(%arg0: i32, %arg1: i32) -> (i32, i32) {
    %c0_i32 = arith.constant 0 : i32
    %c0_i32_0 = arith.constant 0 : i32
    %c0_i32_1 = arith.constant 0 : i32
    return %c0_i32, %c0_i32_0 : i32, i32
  }
  func.func @transform_8(%arg0: i32, %arg1: i32) -> (i32, i32) {
    %c0_i32 = arith.constant 0 : i32
    %c0_i32_0 = arith.constant 0 : i32
    %c0_i32_1 = arith.constant 0 : i32
    return %c0_i32, %c0_i32_0 : i32, i32
  }
  func.func @transform_9(%arg0: i32, %arg1: i32) -> (i32, i32) {
    %c0_i32 = arith.constant 0 : i32
    %c0_i32_0 = arith.constant 0 : i32
    %c0_i32_1 = arith.constant 0 : i32
    return %c0_i32, %c0_i32_0 : i32, i32
  }
  func.func @transform_10(%arg0: i32, %arg1: i32) -> (i32, i32) {
    %c0_i32 = arith.constant 0 : i32
    %c0_i32_0 = arith.constant 0 : i32
    %c0_i32_1 = arith.constant 0 : i32
    return %c0_i32, %c0_i32_0 : i32, i32
  }
  func.func @transform_11(%arg0: i32, %arg1: i32) -> (i32, i32) {
    %c0_i32 = arith.constant 0 : i32
    %c0_i32_0 = arith.constant 0 : i32
    %c0_i32_1 = arith.constant 0 : i32
    return %c0_i32, %c0_i32_0 : i32, i32
  }
  func.func @transform_12(%arg0: i32, %arg1: i32) -> (i32, i32) {
    %c0_i32 = arith.constant 0 : i32
    %c0_i32_0 = arith.constant 0 : i32
    %c0_i32_1 = arith.constant 0 : i32
    return %c0_i32, %c0_i32_0 : i32, i32
  }
  func.func @transform_13(%arg0: i32, %arg1: i32) -> (i32, i32, i32) {
    %c0_i32 = arith.constant 0 : i32
    %c0_i32_0 = arith.constant 0 : i32
    return %arg0, %arg1, %c0_i32 : i32, i32, i32
  }
  func.func @transform_14(%arg0: i32, %arg1: i32) -> (i32, i32, i32) {
    %c0_i32 = arith.constant 0 : i32
    %c0_i32_0 = arith.constant 0 : i32
    return %arg0, %arg1, %c0_i32 : i32, i32, i32
  }
}

</mosaic_0001>

<bundles_post_ra>
// kernel: tpu_custom_call.1
= control target key start
LH: loop header
LB: loop body
LE: loop exit
PB: predicated region body
PF: predicated region fallthrough
CT: control target
= control target key end

     0   :  { %s2852_s0 = inlined_call_operand.vmem [shape: bf16[2,16,128], index: 0, kind: input, shape index: {}]   ;;  %s2853_s1 = inlined_call_operand.hbm [shape: bf16[2,128,256], index: 1, kind: input, shape index: {}]   ;;  %s2854_s2 = inlined_call_operand.vmem [shape: s32[2,1,128], index: 2, kind: input, shape index: {}]   ;;  %s2855_s3 = inlined_call_operand.vmem [shape: bf16[128,64], index: 3, kind: input, shape index: {}]   ;;  %s2856_s4 = inlined_call_operand.vmem [shape: f32[1,64], index: 4, kind: input, shape index: {}]   ;;  %s2857_s5 = inlined_call_operand.vmem [shape: bf16[64,32], index: 5, kind: input, shape index: {}]   ;;  %s2858_s6 = inlined_call_operand.vmem [shape: f32[1,32], index: 6, kind: input, shape index: {}]   ;;  %s2859_s7 = inlined_call_operand.vmem [shape: bf16[32,32], index: 7, kind: input, shape index: {}]   ;;  %s2860_s8 = inlined_call_operand.vmem [shape: f32[1,32], index: 8, kind: input, shape index: {}]   ;;  %s2861_s9 = inlined_call_operand.vmem [shape: bf16[256,128], index: 9, kind: input, shape index: {}]   ;;  %s2862_s10 = inlined_call_operand.vmem [shape: f32[1,128], index: 10, kind: input, shape index: {}]   ;;  %s2863_s11 = inlined_call_operand.vmem [shape: bf16[128,32], index: 11, kind: input, shape index: {}]   ;;  %s2864_s12 = inlined_call_operand.vmem [shape: f32[1,32], index: 12, kind: input, shape index: {}]   ;;  %s2865_s13 = inlined_call_operand.hbm [shape: f32[2,16,128], index: 13, kind: output, shape index: {0}]   ;;  %s2866_s14 = inlined_call_operand.hbm [shape: f32[2,16,128], index: 14, kind: output, shape index: {1}]  }
   0x1   :  { %2875 = sst [smem:[#allocation17_spill]] %s2852_s0 }
   0x2   :  { %2876 = sst [smem:[#allocation18_spill]] %s2853_s1 }
   0x3   :  { %2877 = sst [smem:[#allocation19_spill]] %s2854_s2 }
   0x4   :  { %2878 = sst [smem:[#allocation20_spill]] %s2860_s8 }
   0x5   :  { %2879 = sst [smem:[#allocation21_spill]] %s2865_s13 }
   0x6   :  { %2880 = sst [smem:[#allocation22_spill]] %s2866_s14 }
   0x7   :  { %20 = vsyncpa [#allocation4], 0 }
   0x8   :  { %22 = vsyncpa [#allocation4 + $0x1], 0 }
   0x9   :  { %23 = vsyncpa [#allocation5], 0 }
   0xa   :  { %25 = vsyncpa [#allocation5 + $0x1], 0 }
   0xb   :  { %26 = vsyncpa [#allocation8], 0 }
   0xc   :  { %28 = vsyncpa [#allocation8 + $0x1], 0  ;;  %s2386_s29 = smov 0   ;;  %s2388_s30 = smov 0  }
   0xd   :  { %s2390_s15 = smov 0   ;;  %s2392_s16 = smov 0  }
   0xe   :  { %s2394_s17 = smov 0   ;;  %s2396_s18 = smov 0  }
   0xf LB: > { %2881 = sst [smem:[#allocation12_spill]] %s2284_s29  ;;  %s1751_s19 = sadd.s32 4294967295, %s2304_s18   ;;  %s2304_s18 = sphi %s2396_s18, %s34_s18   ;;  %s2300_s17 = sphi %s2394_s17, %s2903_s17   ;;  %s2296_s16 = sphi %s2392_s16, %s2902_s16   ;;  %s2292_s15 = sphi %s2390_s15, %s2906_s15   ;;  %s2288_s30 = sphi %s2388_s30, %s2905_s30   ;;  %s2284_s29 = sphi %s2386_s29, %s2904_s29  }
  0x10   : > { %2882 = sst [smem:[#allocation13_spill]] %s2300_s17  ;;  %s1752_s20 = sadd.s32 4294967294, %s2304_s18  }
  0x11   : > { %s46_s21 = sadd.s32 1, %s2300_s17  ;;  %s81_s22 = sadd.s32 1, %s2292_s15 }
  0x12   : > { %p48_p0 = scmp.ge.s32.totalorder %s46_s21, 2  ;;  %p88_p1 = scmp.ne.s32.totalorder %s2292_s15, %s2288_s30 }
  0x13   : > { %p89_p2 = scmp.eq.s32.totalorder %s2304_s18, 0  ;;  %p94_p3 = scmp.ne.s32.totalorder %s2288_s30, %s2284_s29 }
  0x14   : > { %s2908_s21 = smov (%p48_p0, %s46_s21), 0  ;;  %p95_p5 = scmp.eq.s32.totalorder %s1751_s19, 0 }
  0x15   : > { %2883 = sst [smem:[#allocation14_spill]] %s2908_s21  ;;  %p2427_p4 = por %p89_p2, %p88_p1 }
  0x16   : > { %s78_s24 = ssub.s32 %s2300_s17, %s2908_s21  ;;  %p356_p6 = scmp.eq.s32.totalorder %s1751_s19, 1 }
  0x17   : > { %p79_p7 = scmp.eq.s32.totalorder %s78_s24, 0  ;;  %p2433_p8 = por %p95_p5, %p94_p3 }
  0x18   : > { %p2437_p9 = por %p356_p6, %p88_p1  ;;  %p362_p10 = scmp.eq.s32.totalorder %s1752_s20, 1 }
  0x19   : > { %s2442_s27 = scalar_select %p79_p7, %s2292_s15, %s81_s22  }
  0x1a   : > { %s2886_s26 = scalar_select %p2437_p9, 1, 0 }
  0x1b   : > { %2888 = sst [smem:[#allocation16_spill]] %s2442_s27  ;;  %p2444_p11 = por %p362_p10, %p94_p3 }
  0x1c   : > { %2887 = sst [smem:[#allocation15_spill]] %s2886_s26  ;;  %p1754_p12 = scmp.ge.s32.totalorder %s2304_s18, 2 }
  0x1d   : > { %p2088_p13 = scmp.lt.s32.totalorder %s2304_s18, 2  ;;  %s453_s19 = sand.u32 1, %s2292_s15  }
  0x1e   : > { %s1755_s24 = sshll.u32 %s453_s19, 7  ;;  %s2012_s21 = sshll.u32 %s2300_s17, 7 }
  0x1f   : > { %s2890_s1 = sld [smem:[#allocation18_spill]]  ;;  %s457_s2 = scalar_lea.vmem [#allocation3], %s1755_s24 }
  0x20   : > { %s465_s26 = sshll.u32 %s457_s2, 4  ;;  %p2078_p0 = pnand %p2088_p13, %p2427_p4  ;;  %s466_s26 = int_to_ptr.vmem [resolvable:$true] %s465_s26 }
  0x21   : > { %p1758_p1 = scmp.ge.s32.totalorder %s2304_s18, 1  ;;  %s454_s20 = scalar_lea.sflag [#allocation4], %s453_s19 }
  0x22   : > { %s2306_s22 = smov 128   ;;  %s2307_s27 = smov 8  }
  0x23   : > { %p479_p2 = scmp.lt.s32.totalorder %s2304_s18, 3 }
  0x25   : > { %s462_s14 = scalar_lea.hbm %s2890_s1, %s2012_s21  ;;  %p480_p3 = pnand %p1758_p1, %p479_p2 }
  0x26   : > { %s463_s8 = sshll.u32 %s462_s14, 4  ;;  %s2460_s17 = sand.u32 (!%p480_p3), 1, %s2288_s30   ;;  %s464_s8 = int_to_ptr.hbm [resolvable:$true] %s463_s8 }
  0x27   : > { %2080 = dma.hbm_to_vmem [thread:$0]  (!%p2078_p0), %s464_s8, 2048, %s466_s26, %s454_s20, %s2306_s22, %s2306_s22, %s2307_s27  }
  0x28   : > { %483 = sbr.rel (%p480_p3) target bundleno = 968 (0x3c8), region = 72  ;;  %s1759_s2 = sshll.u32 (!%p480_p3), %s2460_s17, 7 }
  0x29   : > { %s486_s13 = scalar_lea.sflag (!%p480_p3), [#allocation4], %s2460_s17  ;;  %s2464_s14 = scalar_lea.vmem (!%p480_p3), [#allocation3], %s1759_s2 }
  0x2d   : > { %2271 = dma.done.wait (%p2433_p8), %s486_s13, 2048  }
  0x2e   : > { %2273 = vsyncadd (%p2433_p8), %s486_s13, 4294965248  ;;  %v2037_v0 = vld [vmem:[%s2861_s9 + $0x38] sm:$0xff]  ;;  %v2036_v3 = vld [vmem:[%s2861_s9 + $0x30] sm:$0xff]  ;;  %p553_p4 = scmp.lt.s32.totalorder %s2296_s16, 1  ;;  %s2891_s0 = sld [smem:[#allocation17_spill]]  ;;  %vm1185_vm0 = vcmask 523264  }
  0x2f   : > { %v2045_v1 = vld [vmem:[%s2861_s9 + $0x78] sm:$0xff]  ;;  %800 = vmatpush.bf16.msra.mxu0 %v2037_v0  ;;  %v2044_v4 = vld [vmem:[%s2861_s9 + $0x70] sm:$0xff]  ;;  %v2035_v6 = vld [vmem:[%s2861_s9 + $0x28] sm:$0xff]  ;;  %vm1039_vm1 = vcmask 261120   ;;  %s2892_s21 = sld [smem:[#allocation20_spill]]  ;;  %vm1430_vm2 = vcmask 130112  }
  0x30   : > { %v2062_v2 = vld [vmem:[%s2855_s3 + $0x38] sm:$0xff]  ;;  %849 = vmatpush.bf16.msra.mxu1 %v2045_v1  ;;  %v2061_v5 = vld [vmem:[%s2855_s3 + $0x30] sm:$0xff]  ;;  %v2043_v7 = vld [vmem:[%s2861_s9 + $0x68] sm:$0xff]  ;;  %s2526_s22 = scalar_select %p553_p4, %s2296_s16, 1  ;;  %vm1434_vm3 = vcmask 195712   ;;  %vm1438_vm4 = vcmask 261312  }
  0x31   : > { %1132 = vmatpush.bf16.msra.mxu3 %v2062_v2  ;;  %v2060_v8 = vld [vmem:[%s2855_s3 + $0x28] sm:$0xff]  ;;  %v2034_v9 = vld [vmem:[%s2861_s9 + $0x20] sm:$0xff]  ;;  %v2033_v12 = vld [vmem:[%s2861_s9 + $0x18] sm:$0xff]  ;;  %vm1442_vm5 = vcmask 326912   ;;  %vm1446_vm6 = vcmask 392512   ;;  %vm1450_vm7 = vcmask 458112  }
  0x32   : > { %v2042_v10 = vld [vmem:[%s2861_s9 + $0x60] sm:$0xff]  ;;  %v2041_v13 = vld [vmem:[%s2861_s9 + $0x58] sm:$0xff]  ;;  %v2032_v15 = vld [vmem:[%s2861_s9 + $0x10] sm:$0xff]  ;;  %s2013_s26 = sshll.u32 %s2526_s22, 3  ;;  %vm1454_vm8 = vcmask 523712   ;;  %vm1458_vm9 = vcmask 589312  }
  0x33   : > { %801 = vmatpush.bf16.msra.mxu0 %v2036_v3  ;;  %v2059_v11 = vld [vmem:[%s2855_s3 + $0x20] sm:$0xff]  ;;  %v2058_v14 = vld [vmem:[%s2855_s3 + $0x18] sm:$0xff]  ;;  %v2040_v16 = vld [vmem:[%s2861_s9 + $0x50] sm:$0xff]  ;;  %vm1462_vm10 = vcmask 654912   ;;  %vm1466_vm11 = vcmask 720512   ;;  %vm1470_vm12 = vcmask 786112  }
  0x34   : > { %850 = vmatpush.bf16.msra.mxu1 %v2044_v4  ;;  %v2057_v17 = vld [vmem:[%s2855_s3 + $0x10] sm:$0xff]  ;;  %v2031_v18 = vld [vmem:[%s2861_s9 + $0x8] sm:$0xff]  ;;  %v2030_v21 = vld [vmem:[%s2861_s9] sm:$0xff]  ;;  %s560_s8 = scalar_lea.vmem %s2891_s0, %s2013_s26  ;;  %vm1474_vm13 = vcmask 851712   ;;  %vm1478_vm14 = vcmask 917312   ;;  %vm1482_vm15 = vcmask 982912  }
  0x35   : > { %1133 = vmatpush.bf16.msra.mxu3 %v2061_v5  ;;  %v2039_v19 = vld [vmem:[%s2861_s9 + $0x48] sm:$0xff]  ;;  %v2038_v22 = vld [vmem:[%s2861_s9 + $0x40] sm:$0xff]  ;;  %v1774_v31 = vld [vmem:[%s2464_s14 + $0x10] sm:$0xf]  ;;  %s2893_s27 = sld [smem:[#allocation19_spill]]  ;;  %s2874_s24 = sshll.u32 %s2460_s17, 4 }
  0x36   : > { %v2056_v20 = vld [vmem:[%s2855_s3 + $0x8] sm:$0xff]  ;;  %v1766_v23 = vld [vmem:[%s2464_s14] sm:$0xf]  ;;  %v2014_v25 = vld [vmem:[%s2464_s14 + $0x4] sm:$0xf]  ;;  %s2069_s2 = sshll.u32 %s2296_s16, 4 }
  0x37   : > { %802 = vmatpush.bf16.msra.mxu0 %v2035_v6  ;;  %v2015_v24 = vld [vmem:[%s2464_s14 + $0x4] sm:$0xf0]  ;;  %v1768_v26 = vld [vmem:[%s2464_s14 + $0x8] sm:$0xf0]  ;;  %v2055_v27 = vld [vmem:[%s2855_s3] sm:$0xff]  ;;  %s1568_s23 = scalar_lea.sflag [#allocation8], %s2460_s17 }
  0x38   : > { %851 = vmatpush.bf16.msra.mxu1 %v2043_v7  ;;  %v1767_v28 = vor.u32 %v2015_v24, %v1766_v23  ;;  %v1771_v29 = vor.u32 %v2014_v25, %v1768_v26  ;;  %v2054_v30 = vld [vmem:[%s560_s8] sm:$0xff]  ;;  %v2017_v32 = vld [vmem:[%s2464_s14 + $0x14] sm:$0xf0]  ;;  %v2016_v33 = vld [vmem:[%s2464_s14 + $0x14] sm:$0xf]  ;;  %s2897_s8 = sld [smem:[#allocation22_spill]] }
  0x39   : > { %1134 = vmatpush.bf16.msra.mxu3 %v2060_v8  ;;  %v1776_v34 = vld [vmem:[%s2464_s14 + $0x18] sm:$0xf0]  ;;  %v1775_v35 = vor.u32 %v2017_v32, %v1774_v31  ;;  %v1782_v37 = vld [vmem:[%s2464_s14 + $0x20] sm:$0xf]  ;;  %v2019_v38 = vld [vmem:[%s2464_s14 + $0x24] sm:$0xf0] }
  0x3a   : > { %v1779_v36 = vor.u32 %v2016_v33, %v1776_v34  ;;  %v2018_v39 = vld [vmem:[%s2464_s14 + $0x24] sm:$0xf]  ;;  %v1784_v40 = vld [vmem:[%s2464_s14 + $0x28] sm:$0xf0]  ;;  %v1783_v41 = vor.u32 %v2019_v38, %v1782_v37  ;;  %v1790_v43 = vld [vmem:[%s2464_s14 + $0x30] sm:$0xf] }
  0x3b   : > { %803 = vmatpush.bf16.msra.mxu0 %v2034_v9  ;;  %v1787_v42 = vor.u32 %v2018_v39, %v1784_v40  ;;  %v2021_v44 = vld [vmem:[%s2464_s14 + $0x34] sm:$0xf0]  ;;  %v2020_v45 = vld [vmem:[%s2464_s14 + $0x34] sm:$0xf]  ;;  %v1792_v46 = vld [vmem:[%s2464_s14 + $0x38] sm:$0xf0]  ;;  %s564_s19 = scalar_lea.vmem %s2893_s27, %s2526_s22 }
  0x3c   : > { %852 = vmatpush.bf16.msra.mxu1 %v2042_v10  ;;  %v1791_v47 = vor.u32 %v2021_v44, %v1790_v43  ;;  %v1795_v48 = vor.u32 %v2020_v45, %v1792_v46  ;;  %v1798_v49 = vld [vmem:[%s2464_s14 + $0x40] sm:$0xf]  ;;  %v2023_v50 = vld [vmem:[%s2464_s14 + $0x44] sm:$0xf0]  ;;  %v2022_v51 = vld [vmem:[%s2464_s14 + $0x44] sm:$0xf] }
  0x3d   : > { %1135 = vmatpush.bf16.msra.mxu3 %v2059_v11  ;;  %v1800_v52 = vld [vmem:[%s2464_s14 + $0x48] sm:$0xf0]  ;;  %v1799_v53 = vor.u32 %v2023_v50, %v1798_v49  ;;  %v2053_v55 = vld [vmem:[%s2863_s11 + $0x38] sm:$0xff]  ;;  %v1806_v56 = vld [vmem:[%s2464_s14 + $0x50] sm:$0xf]  ;;  %s551_s22 = scalar_lea.vmem [#allocation7], %s2874_s24 }
  0x3e   : > { %v1803_v54 = vor.u32 %v2022_v51, %v1800_v52  ;;  %990 = vmatpush.bf16.msra.mxu2 %v2053_v55  ;;  %v2025_v57 = vld [vmem:[%s2464_s14 + $0x54] sm:$0xf0]  ;;  %v2024_v58 = vld [vmem:[%s2464_s14 + $0x54] sm:$0xf]  ;;  %v1808_v59 = vld [vmem:[%s2464_s14 + $0x58] sm:$0xf0] }
  0x3f   : > { %804 = vmatpush.bf16.msra.mxu0 %v2033_v12  ;;  %v1807_v60 = vor.u32 %v2025_v57, %v1806_v56  ;;  %v1811_v61 = vor.u32 %v2024_v58, %v1808_v59  ;;  %v2052_v62 = vld [vmem:[%s2863_s11 + $0x30] sm:$0xff]  ;;  %v2051_v63 = vld [vmem:[%s2863_s11 + $0x28] sm:$0xff]  ;;  %v2050_v0 = vld [vmem:[%s2863_s11 + $0x20] sm:$0xff]  ;;  %s1601_s20 = sshll.u32 %s551_s22, 4  ;;  %s2210_s24 = scalar_lea.hbm %s2897_s8, 32  ;;  %s1602_s20 = int_to_ptr.vmem [resolvable:$true] %s1601_s20 }
  0x40   : > { %853 = vmatpush.bf16.msra.mxu1 %v2041_v13  ;;  %v1814_v1 = vld [vmem:[%s2464_s14 + $0x60] sm:$0xf]  ;;  %v2027_v2 = vld [vmem:[%s2464_s14 + $0x64] sm:$0xf0]  ;;  %v2026_v3 = vld [vmem:[%s2464_s14 + $0x64] sm:$0xf] }
  0x41   : > { %1136 = vmatpush.bf16.msra.mxu3 %v2058_v14  ;;  %v1816_v4 = vld [vmem:[%s2464_s14 + $0x68] sm:$0xf0]  ;;  %v1815_v5 = vor.u32 %v2027_v2, %v1814_v1  ;;  %v2049_v7 = vld [vmem:[%s2863_s11 + $0x18] sm:$0xff]  ;;  %v2048_v8 = vld [vmem:[%s2863_s11 + $0x10] sm:$0xff] }
  0x42   : > { %991 = vmatpush.bf16.msra.mxu2 %v2052_v62  ;;  %v1819_v6 = vor.u32 %v2026_v3, %v1816_v4  ;;  %v2066_v9 = vld [vmem:[%s2857_s5 + $0x18] sm:$0xff]  ;;  %v2047_v10 = vld [vmem:[%s2863_s11 + $0x8] sm:$0xff]  ;;  %v2065_v11 = vld [vmem:[%s2857_s5 + $0x10] sm:$0xff] }
  0x43   : > { %805 = vmatpush.bf16.msra.mxu0 %v2032_v15  ;;  %v1822_v12 = vld [vmem:[%s2464_s14 + $0x70] sm:$0xf]  ;;  %v2029_v13 = vld [vmem:[%s2464_s14 + $0x74] sm:$0xf0]  ;;  %v2028_v14 = vld [vmem:[%s2464_s14 + $0x74] sm:$0xf] }
  0x44   : > { %854 = vmatpush.bf16.msra.mxu1 %v2040_v16  ;;  %v1824_v15 = vld [vmem:[%s2464_s14 + $0x78] sm:$0xf0]  ;;  %v2046_v16 = vld [vmem:[%s2863_s11] sm:$0xff]  ;;  %s1600_s14 = scalar_lea.hbm %s2897_s8, %s2069_s2 }
  0x45   : > { %1137 = vmatpush.bf16.msra.mxu3 %v2057_v17  ;;  %v2064_v17 = vld [vmem:[%s2857_s5 + $0x8] sm:$0xff]  ;;  %v2621_v23 = vld [vmem:[%s2862_s10] ss:$0 sm:$0xff] }
  0x46   : > { %992 = vmatpush.bf16.msra.mxu2 %v2051_v63  ;;  %v2144_v26 = vld [vmem:[%s2856_s4] ss:$0 sm:$0xff] }
  0x47   : > { %806 = vmatpush.bf16.msra.mxu0 %v2031_v18  ;;  %v1823_v18 = vor.u32 %v2029_v13, %v1822_v12 }
  0x48   : > { %855 = vmatpush.bf16.msra.mxu1 %v2039_v19  ;;  %v1827_v19 = vor.u32 %v2028_v14, %v1824_v15 }
  0x49   : > { %1138 = vmatpush.bf16.msra.mxu3 %v2056_v20  ;;  %v2063_v20 = vld [vmem:[%s2857_s5] sm:$0xff] }
  0x4a   : > { %993 = vmatpush.bf16.msra.mxu2 %v2050_v0 }
  0x4b   : > { %807 = vmatpush.bf16.msra.mxu0 %v2030_v21 }
  0x4c   : > { %856 = vmatpush.bf16.msra.mxu1 %v2038_v22 }
  0x4d   : > { %1139 = vmatpush.bf16.msra.mxu3 %v2055_v27 }
  0x4e   : > { %808 = vmatmul.bf16.vlgmr.msra.gmra.mxu0 %v1767_v28  ;;  %994 = vmatpush.bf16.msra.mxu2 %v2049_v7 }
  0x4f   : > { %857 = vmatmul.bf16.vlgmr.msra.gmra.mxu1 %v1771_v29 }
  0x50   : > { %1140 = vmatmul.bf16.vlgmr.msra.gmra.mxu3 %v2054_v30 }
  0x51   : > { %1193 = vmatpush.bf16.msrb.mxu3 %v2066_v9 }
  0x52   : > { %995 = vmatpush.bf16.msra.mxu2 %v2048_v8 }
  0x55   : > { %1194 = vmatpush.bf16.msrb.mxu3 %v2065_v11 }
  0x56   : > { %996 = vmatpush.bf16.msra.mxu2 %v2047_v10 }
  0x59   : > { %1195 = vmatpush.bf16.msrb.mxu3 %v2064_v17 }
  0x5a   : > { %997 = vmatpush.bf16.msra.mxu2 %v2046_v16 }
  0x5d   : > { %1196 = vmatpush.bf16.msrb.mxu3 %v2063_v20 }
  0x5e   : > { %813 = vmatmul.bf16.gmra.mxu0 %v1775_v35 }
  0x5f   : > { %862 = vmatmul.bf16.gmra.mxu1 %v1779_v36 }
  0x6e   : > { %818 = vmatmul.bf16.gmra.mxu0 %v1783_v41 }
  0x6f   : > { %867 = vmatmul.bf16.gmra.mxu1 %v1787_v42 }
  0x7e   : > { %823 = vmatmul.bf16.gmra.mxu0 %v1791_v47 }
  0x7f   : > { %872 = vmatmul.bf16.gmra.mxu1 %v1795_v48 }
  0x8e   : > { %828 = vmatmul.bf16.gmra.mxu0 %v1799_v53 }
  0x8f   : > { %877 = vmatmul.bf16.gmra.mxu1 %v1803_v54 }
  0x9e   : > { %833 = vmatmul.bf16.gmra.mxu0 %v1807_v60 }
  0x9f   : > { %882 = vmatmul.bf16.gmra.mxu1 %v1811_v61 }
  0xae   : > { %838 = vmatmul.bf16.gmra.mxu0 %v1815_v5 }
  0xaf   : > { %887 = vmatmul.bf16.gmra.mxu1 %v1819_v6 }
  0xbe   : > { %843 = vmatmul.bf16.gmra.mxu0 %v1823_v18 }
  0xbf   : > { %892 = vmatmul.bf16.gmra.mxu1 %v1827_v19 }
  0xcb   : > { %v809_v21 = vpop.f32.mrf.mxu0 }
  0xcc   : > { %v858_v22 = vpop.f32.mrf.mxu1  ;;  %v810_v24 = vadd.f32 %v2621_v23, %v809_v21 }
  0xce   : > { %v859_v29 = vadd.f32 %v858_v22, %v810_v24 }
  0xd0   : > { %v898_v33 = vmax.f32 %v859_v29, 0.0 }
  0xd3   : > { %v1141_v25 = vpop.f32.mrf.mxu3  ;;  %v811_v27 = vpop.f32.mrf.mxu0 }
  0xd4   : > { %v860_v28 = vpop.f32.mrf.mxu1  ;;  %v812_v30 = vadd.f32 %v2621_v23, %v811_v27  ;;  %v1142_v32 = vadd.f32 %v2144_v26, %v1141_v25 }
  0xd6   : > { %v861_v31 = vadd.f32 %v860_v28, %v812_v30  ;;  %v1146_v37 = vmax.f32 %v1142_v32, 0.0 }
  0xd8   : > { %v899_v34 = vmax.f32 %v861_v31, 0.0 }
  0xda   : > { %v914_v36 = vpack.c.bf16 %v899_v34, %v898_v33 }
  0xdb   : > { %v1143_v35 = vpop.f32.mrf.mxu3  ;;  %v814_v39 = vpop.f32.mrf.mxu0 }
  0xdc   : > { %v1144_v38 = vadd.f32 %v2144_v26, %v1143_v35  ;;  %v863_v40 = vpop.f32.mrf.mxu1  ;;  %998 = vmatmul.bf16.vlgmr.msra.gmra.mxu2 %v914_v36  ;;  %v815_v43 = vadd.f32 %v2621_v23, %v814_v39 }
  0xde   : > { %v1147_v41 = vmax.f32 %v1144_v38, 0.0  ;;  %v864_v46 = vadd.f32 %v863_v40, %v815_v43 }
  0xe0   : > { %v1148_v42 = vpack.c.bf16 %v1147_v41, %v1146_v37  ;;  %v900_v49 = vmax.f32 %v864_v46, 0.0 }
  0xe2   : > { %1976 = vmatmul.msk.bf16.vlgmr.msrb.gmra.mxu3 %vm1185_vm0, %v1148_v42  ;;  %vm1486_vm0 = vcmask 1048512  }
  0xe3   : > { %v816_v44 = vpop.f32.mrf.mxu0 }
  0xe4   : > { %v865_v45 = vpop.f32.mrf.mxu1  ;;  %v817_v47 = vadd.f32 %v2621_v23, %v816_v44 }
  0xe6   : > { %v866_v48 = vadd.f32 %v865_v45, %v817_v47 }
  0xe8   : > { %v901_v50 = vmax.f32 %v866_v48, 0.0 }
  0xea   : > { %v915_v51 = vpack.c.bf16 %v901_v50, %v900_v49 }
  0xeb   : > { %v819_v52 = vpop.f32.mrf.mxu0 }
  0xec   : > { %v868_v53 = vpop.f32.mrf.mxu1  ;;  %1003 = vmatmul.bf16.gmra.mxu2 %v915_v51  ;;  %v820_v54 = vadd.f32 %v2621_v23, %v819_v52 }
  0xee   : > { %v869_v57 = vadd.f32 %v868_v53, %v820_v54 }
  0xf0   : > { %v902_v60 = vmax.f32 %v869_v57, 0.0 }
  0xf3   : > { %v821_v55 = vpop.f32.mrf.mxu0 }
  0xf4   : > { %v870_v56 = vpop.f32.mrf.mxu1  ;;  %v822_v58 = vadd.f32 %v2621_v23, %v821_v55  ;;  %v2068_v55 = vld [vmem:[%s2859_s7 + $0x8] sm:$0xff] }
  0xf5   : > { %1236 = vmatpush.bf16.msra.mxu3 %v2068_v55 }
  0xf6   : > { %v871_v59 = vadd.f32 %v870_v56, %v822_v58  ;;  %v2067_v56 = vld [vmem:[%s2859_s7] sm:$0xff] }
  0xf8   : > { %v903_v61 = vmax.f32 %v871_v59, 0.0 }
  0xf9   : > { %1237 = vmatpush.bf16.msra.mxu3 %v2067_v56 }
  0xfa   : > { %v916_v62 = vpack.c.bf16 %v903_v61, %v902_v60  ;;  %v2146_v60 = vld [vmem:[%s2858_s6] ss:$0 sm:$0xff] }
  0xfb   : > { %v824_v63 = vpop.f32.mrf.mxu0 }
  0xfc   : > { %v873_v0 = vpop.f32.mrf.mxu1  ;;  %1008 = vmatmul.bf16.gmra.mxu2 %v916_v62  ;;  %v825_v1 = vadd.f32 %v2621_v23, %v824_v63 }
  0xfe   : > { %v874_v4 = vadd.f32 %v873_v0, %v825_v1 }
 0x100   : > { %v904_v7 = vmax.f32 %v874_v4, 0.0 }
 0x103   : > { %v826_v2 = vpop.f32.mrf.mxu0 }
 0x104   : > { %v875_v3 = vpop.f32.mrf.mxu1  ;;  %v827_v5 = vadd.f32 %v2621_v23, %v826_v2 }
 0x106   : > { %v876_v6 = vadd.f32 %v875_v3, %v827_v5 }
 0x108   : > { %v905_v8 = vmax.f32 %v876_v6, 0.0 }
 0x10a   : > { %v917_v9 = vpack.c.bf16 %v905_v8, %v904_v7 }
 0x10b   : > { %v829_v10 = vpop.f32.mrf.mxu0 }
 0x10c   : > { %v878_v11 = vpop.f32.mrf.mxu1  ;;  %1013 = vmatmul.bf16.gmra.mxu2 %v917_v9  ;;  %v830_v12 = vadd.f32 %v2621_v23, %v829_v10 }
 0x10e   : > { %v879_v15 = vadd.f32 %v878_v11, %v830_v12 }
 0x110   : > { %v906_v18 = vmax.f32 %v879_v15, 0.0 }
 0x113   : > { %v831_v13 = vpop.f32.mrf.mxu0 }
 0x114   : > { %v880_v14 = vpop.f32.mrf.mxu1  ;;  %v832_v16 = vadd.f32 %v2621_v23, %v831_v13 }
 0x116   : > { %v881_v17 = vadd.f32 %v880_v14, %v832_v16 }
 0x118   : > { %v907_v19 = vmax.f32 %v881_v17, 0.0 }
 0x11a   : > { %v918_v20 = vpack.c.bf16 %v907_v19, %v906_v18 }
 0x11b   : > { %v834_v21 = vpop.f32.mrf.mxu0 }
 0x11c   : > { %v883_v22 = vpop.f32.mrf.mxu1  ;;  %1018 = vmatmul.bf16.gmra.mxu2 %v918_v20  ;;  %v835_v24 = vadd.f32 %v2621_v23, %v834_v21 }
 0x11e   : > { %v884_v27 = vadd.f32 %v883_v22, %v835_v24 }
 0x120   : > { %v908_v30 = vmax.f32 %v884_v27, 0.0 }
 0x123   : > { %v836_v25 = vpop.f32.mrf.mxu0 }
 0x124   : > { %v885_v26 = vpop.f32.mrf.mxu1  ;;  %v837_v28 = vadd.f32 %v2621_v23, %v836_v25 }
 0x126   : > { %v886_v29 = vadd.f32 %v885_v26, %v837_v28 }
 0x128   : > { %v909_v31 = vmax.f32 %v886_v29, 0.0 }
 0x12a   : > { %v919_v32 = vpack.c.bf16 %v909_v31, %v908_v30 }
 0x12b   : > { %v839_v33 = vpop.f32.mrf.mxu0 }
 0x12c   : > { %v888_v34 = vpop.f32.mrf.mxu1  ;;  %1023 = vmatmul.bf16.gmra.mxu2 %v919_v32  ;;  %v840_v35 = vadd.f32 %v2621_v23, %v839_v33 }
 0x12e   : > { %v889_v38 = vadd.f32 %v888_v34, %v840_v35 }
 0x130   : > { %v910_v41 = vmax.f32 %v889_v38, 0.0 }
 0x133   : > { %v841_v36 = vpop.f32.mrf.mxu0 }
 0x134   : > { %v890_v37 = vpop.f32.mrf.mxu1  ;;  %v842_v39 = vadd.f32 %v2621_v23, %v841_v36 }
 0x136   : > { %v891_v40 = vadd.f32 %v890_v37, %v842_v39 }
 0x138   : > { %v911_v42 = vmax.f32 %v891_v40, 0.0 }
 0x13a   : > { %v920_v43 = vpack.c.bf16 %v911_v42, %v910_v41 }
 0x13b   : > { %v844_v44 = vpop.f32.mrf.mxu0 }
 0x13c   : > { %v893_v45 = vpop.f32.mrf.mxu1  ;;  %1028 = vmatmul.bf16.gmra.mxu2 %v920_v43  ;;  %v845_v46 = vadd.f32 %v2621_v23, %v844_v44 }
 0x13e   : > { %v894_v48 = vadd.f32 %v893_v45, %v845_v46 }
 0x140   : > { %v912_v52 = vmax.f32 %v894_v48, 0.0 }
 0x143   : > { %v846_v47 = vpop.f32.mrf.mxu0 }
 0x144   : > { %v847_v49 = vadd.f32 %v2621_v23, %v846_v47  ;;  %v895_v50 = vpop.f32.mrf.mxu1  ;;  %v2651_v23 = vld [vmem:[%s2864_s12] ss:$0 sm:$0xff] }
 0x146   : > { %v896_v51 = vadd.f32 %v895_v50, %v847_v49 }
 0x148   : > { %v913_v53 = vmax.f32 %v896_v51, 0.0 }
 0x14a   : > { %v921_v54 = vpack.c.bf16 %v913_v53, %v912_v52 }
 0x14c   : > { %1033 = vmatmul.bf16.gmra.mxu2 %v921_v54 }
 0x15f   : > { %v999_v57 = vpop.f32.mrf.mxu2 }
 0x160   : > { %v1000_v58 = vadd.f32 %v2651_v23, %v999_v57 }
 0x162   : > { %1040 = vst.msk [vmem:[#allocation2] sm:$0xff] %vm1039_vm1, %v1000_v58 }
 0x165   : > { %v1198_v59 = vpop.f32.mrf.mxu3 }
 0x166   : > { %v1199_v63 = vadd.f32 %v2146_v60, %v1198_v59 }
 0x167   : > { %v1001_v61 = vpop.f32.mrf.mxu2 }
 0x168   : > { %v1002_v62 = vadd.f32 %v2651_v23, %v1001_v61  ;;  %v1203_v4 = vmax.f32 %v1199_v63, 0.0 }
 0x169   : > { %v2659_v0 = vld [vmem:[#allocation2] sm:$0xff] }
 0x16a   : > { %1041 = vst.msk [vmem:[#allocation2 + $0x8] sm:$0xff] %vm1039_vm1, %v1002_v62  ;;  %v1268_v1 = vmul.f32 %v2659_v0, %v2659_v0 }
 0x16c   : > { %v1284_v3 = vsel %vm1039_vm1, %v1268_v1, 0.0 }
 0x16d   : > { %v1200_v2 = vpop.f32.mrf.mxu3  ;;  %1285 = vadd.xlane.f32.xlu0 %v1284_v3 }
 0x16e   : > { %v1201_v5 = vadd.f32 %v2146_v60, %v1200_v2 }
 0x16f   : > { %v1004_v7 = vpop.f32.mrf.mxu2 }
 0x170   : > { %v1204_v6 = vmax.f32 %v1201_v5, 0.0  ;;  %v1005_v8 = vadd.f32 %v2651_v23, %v1004_v7 }
 0x171   : > { %v2666_v10 = vld [vmem:[#allocation2 + $0x8] sm:$0xff] }
 0x172   : > { %v1205_v9 = vpack.c.bf16 %v1204_v6, %v1203_v4  ;;  %1042 = vst.msk [vmem:[#allocation2 + $0x10] sm:$0xff] %vm1039_vm1, %v1005_v8  ;;  %v1269_v11 = vmul.f32 %v2666_v10, %v2666_v10 }
 0x174   : > { %1985 = vmatmul.msk.bf16.vlgmr.msra.gmra.mxu3 %vm1039_vm1, %v1205_v9  ;;  %v1287_v12 = vsel %vm1039_vm1, %v1269_v11, 0.0 }
 0x175   : > { %1288 = vadd.xlane.f32.xlu0 %v1287_v12 }
 0x177   : > { %v1006_v13 = vpop.f32.mrf.mxu2 }
 0x178   : > { %v1007_v14 = vadd.f32 %v2651_v23, %v1006_v13 }
 0x179   : > { %v2674_v15 = vld [vmem:[#allocation2 + $0x10] sm:$0xff] }
 0x17a   : > { %1043 = vst.msk [vmem:[#allocation2 + $0x18] sm:$0xff] %vm1039_vm1, %v1007_v14  ;;  %v1270_v16 = vmul.f32 %v2674_v15, %v2674_v15 }
 0x17c   : > { %v1290_v17 = vsel %vm1039_vm1, %v1270_v16, 0.0 }
 0x17d   : > { %1291 = vadd.xlane.f32.xlu1 %v1290_v17 }
 0x17f   : > { %v1009_v18 = vpop.f32.mrf.mxu2 }
 0x180   : > { %v1010_v19 = vadd.f32 %v2651_v23, %v1009_v18 }
 0x181   : > { %v2681_v20 = vld [vmem:[#allocation2 + $0x18] sm:$0xff] }
 0x182   : > { %1044 = vst.msk [vmem:[#allocation2 + $0x20] sm:$0xff] %vm1039_vm1, %v1010_v19  ;;  %v1271_v21 = vmul.f32 %v2681_v20, %v2681_v20 }
 0x184   : > { %v1293_v22 = vsel %vm1039_vm1, %v1271_v21, 0.0 }
 0x185   : > { %1294 = vadd.xlane.f32.xlu1 %v1293_v22 }
 0x187   : > { %v1011_v24 = vpop.f32.mrf.mxu2 }
 0x188   : > { %v1012_v25 = vadd.f32 %v2651_v23, %v1011_v24 }
 0x189   : > { %v2688_v26 = vld [vmem:[#allocation2 + $0x20] sm:$0xff] }
 0x18a   : > { %1045 = vst.msk [vmem:[#allocation2 + $0x28] sm:$0xff] %vm1039_vm1, %v1012_v25  ;;  %v1272_v27 = vmul.f32 %v2688_v26, %v2688_v26 }
 0x18c   : > { %v1296_v28 = vsel %vm1039_vm1, %v1272_v27, 0.0 }
 0x18d   : > { %1297 = vadd.xlane.f32.xlu2 %v1296_v28 }
 0x18f   : > { %v1014_v29 = vpop.f32.mrf.mxu2 }
 0x190   : > { %v1015_v30 = vadd.f32 %v2651_v23, %v1014_v29 }
 0x191   : > { %v2695_v31 = vld [vmem:[#allocation2 + $0x28] sm:$0xff] }
 0x192   : > { %1046 = vst.msk [vmem:[#allocation2 + $0x30] sm:$0xff] %vm1039_vm1, %v1015_v30  ;;  %v1273_v32 = vmul.f32 %v2695_v31, %v2695_v31 }
 0x194   : > { %v1299_v33 = vsel %vm1039_vm1, %v1273_v32, 0.0 }
 0x195   : > { %1300 = vadd.xlane.f32.xlu2 %v1299_v33 }
 0x197   : > { %v1016_v34 = vpop.f32.mrf.mxu2 }
 0x198   : > { %v1017_v35 = vadd.f32 %v2651_v23, %v1016_v34 }
 0x199   : > { %v2702_v36 = vld [vmem:[#allocation2 + $0x30] sm:$0xff] }
 0x19a   : > { %1047 = vst.msk [vmem:[#allocation2 + $0x38] sm:$0xff] %vm1039_vm1, %v1017_v35  ;;  %v1274_v37 = vmul.f32 %v2702_v36, %v2702_v36 }
 0x19c   : > { %v1302_v38 = vsel %vm1039_vm1, %v1274_v37, 0.0  ;;  %v1425_v37 = vlaneseq }
 0x19d   : > { %1303 = vadd.xlane.f32.xlu0 %v1302_v38 }
 0x19f   : > { %v1019_v39 = vpop.f32.mrf.mxu2 }
 0x1a0   : > { %v1020_v40 = vadd.f32 %v2651_v23, %v1019_v39 }
 0x1a1   : > { %v2709_v41 = vld [vmem:[#allocation2 + $0x38] sm:$0xff] }
 0x1a2   : > { %1048 = vst.msk [vmem:[#allocation2 + $0x40] sm:$0xff] %vm1039_vm1, %v1020_v40  ;;  %v1275_v42 = vmul.f32 %v2709_v41, %v2709_v41 }
 0x1a4   : > { %v1305_v43 = vsel %vm1039_vm1, %v1275_v42, 0.0 }
 0x1a5   : > { %1306 = vadd.xlane.f32.xlu1 %v1305_v43 }
 0x1a7   : > { %v1021_v44 = vpop.f32.mrf.mxu2 }
 0x1a8   : > { %v1022_v45 = vadd.f32 %v2651_v23, %v1021_v44 }
 0x1a9   : > { %v2716_v46 = vld [vmem:[#allocation2 + $0x40] sm:$0xff] }
 0x1aa   : > { %1049 = vst.msk [vmem:[#allocation2 + $0x48] sm:$0xff] %vm1039_vm1, %v1022_v45  ;;  %v1276_v47 = vmul.f32 %v2716_v46, %v2716_v46 }
 0x1ac   : > { %v1308_v48 = vsel %vm1039_vm1, %v1276_v47, 0.0 }
 0x1ad   : > { %1309 = vadd.xlane.f32.xlu2 %v1308_v48 }
 0x1af   : > { %v1024_v49 = vpop.f32.mrf.mxu2 }
 0x1b0   : > { %v1025_v50 = vadd.f32 %v2651_v23, %v1024_v49 }
 0x1b1   : > { %v1253_v51 = vld [vmem:[#allocation2 + $0x48] sm:$0xff] }
 0x1b2   : > { %1050 = vst.msk [vmem:[#allocation2 + $0x50] sm:$0xff] %vm1039_vm1, %v1025_v50  ;;  %v1277_v52 = vmul.f32 %v1253_v51, %v1253_v51 }
 0x1b4   : > { %v1311_v53 = vsel %vm1039_vm1, %v1277_v52, 0.0 }
 0x1b5   : > { %1312 = vadd.xlane.f32.xlu0 %v1311_v53 }
 0x1b7   : > { %v1026_v54 = vpop.f32.mrf.mxu2 }
 0x1b8   : > { %v1027_v55 = vadd.f32 %v2651_v23, %v1026_v54 }
 0x1b9   : > { %v1254_v56 = vld [vmem:[#allocation2 + $0x50] sm:$0xff] }
 0x1ba   : > { %1051 = vst.msk [vmem:[#allocation2 + $0x58] sm:$0xff] %vm1039_vm1, %v1027_v55  ;;  %v1278_v57 = vmul.f32 %v1254_v56, %v1254_v56 }
 0x1bc   : > { %v1314_v58 = vsel %vm1039_vm1, %v1278_v57, 0.0 }
 0x1bd   : > { %1315 = vadd.xlane.f32.xlu1 %v1314_v58 }
 0x1bf   : > { %v1029_v59 = vpop.f32.mrf.mxu2 }
 0x1c0   : > { %v1030_v60 = vadd.f32 %v2651_v23, %v1029_v59 }
 0x1c1   : > { %v1255_v61 = vld [vmem:[#allocation2 + $0x58] sm:$0xff] }
 0x1c2   : > { %1052 = vst.msk [vmem:[#allocation2 + $0x60] sm:$0xff] %vm1039_vm1, %v1030_v60  ;;  %v1279_v62 = vmul.f32 %v1255_v61, %v1255_v61 }
 0x1c4   : > { %v1317_v63 = vsel %vm1039_vm1, %v1279_v62, 0.0 }
 0x1c5   : > { %1318 = vadd.xlane.f32.xlu2 %v1317_v63 }
 0x1c7   : > { %v1031_v1 = vpop.f32.mrf.mxu2 }
 0x1c8   : > { %v1032_v2 = vadd.f32 %v2651_v23, %v1031_v1 }
 0x1c9   : > { %v1256_v3 = vld [vmem:[#allocation2 + $0x60] sm:$0xff] }
 0x1ca   : > { %1053 = vst.msk [vmem:[#allocation2 + $0x68] sm:$0xff] %vm1039_vm1, %v1032_v2  ;;  %v1280_v4 = vmul.f32 %v1256_v3, %v1256_v3 }
 0x1cc   : > { %v1320_v5 = vsel %vm1039_vm1, %v1280_v4, 0.0 }
 0x1cd   : > { %1321 = vadd.xlane.f32.xlu0 %v1320_v5 }
 0x1cf   : > { %v1034_v6 = vpop.f32.mrf.mxu2 }
 0x1d0   : > { %v1035_v7 = vadd.f32 %v2651_v23, %v1034_v6 }
 0x1d1   : > { %v1257_v8 = vld [vmem:[#allocation2 + $0x68] sm:$0xff] }
 0x1d2   : > { %1054 = vst.msk [vmem:[#allocation2 + $0x70] sm:$0xff] %vm1039_vm1, %v1035_v7  ;;  %v1281_v9 = vmul.f32 %v1257_v8, %v1257_v8 }
 0x1d4   : > { %v1323_v11 = vsel %vm1039_vm1, %v1281_v9, 0.0 }
 0x1d5   : > { %1324 = vadd.xlane.f32.xlu1 %v1323_v11 }
 0x1d7   : > { %v1036_v12 = vpop.f32.mrf.mxu2 }
 0x1d8   : > { %v1037_v13 = vadd.f32 %v2651_v23, %v1036_v12  ;;  %v2147_v23 = vld [vmem:[%s2892_s21] ss:$0 sm:$0xff]  ;;  %s1603_s21 = sshll.u32 %s1600_s14, 4  ;;  %s1604_s21 = int_to_ptr.hbm [resolvable:$true] %s1603_s21 }
 0x1d9   : > { %v1258_v14 = vld [vmem:[#allocation2 + $0x70] sm:$0xff]  ;;  %s2204_s26 = sshra.s32 %s1604_s21, 4  ;;  %s2205_s26 = int_to_ptr.hbm [resolvable:$true] %s2204_s26 }
 0x1da   : > { %1055 = vst.msk [vmem:[#allocation2 + $0x78] sm:$0xff] %vm1039_vm1, %v1037_v13  ;;  %v1282_v16 = vmul.f32 %v1258_v14, %v1258_v14  ;;  %s2206_s27 = scalar_lea.hbm %s2205_s26, 16  ;;  %p2211_p8 = scmp.lt.s32.totalorder %s2205_s26, %s2897_s8 }
 0x1db   : > { %p2207_p5 = scmp.ne.s32.totalorder %s2205_s26, %s2206_s27  ;;  %p2212_p10 = scmp.lt.s32.totalorder %s2210_s24, %s2206_s27 }
 0x1dc   : > { %v1326_v17 = vsel %vm1039_vm1, %v1282_v16, 0.0 }
 0x1dd   : > { %1327 = vadd.xlane.f32.xlu2 %v1326_v17  ;;  %p2208_p6 = pnand %p2207_p5, %p2437_p9  ;;  %p2213_p13 = por %p2212_p10, %p2211_p8 }
 0x1df   : > { %p2209_p7 = pneg %p2208_p6 }
 0x1e1   : > { %v1259_v18 = vld [vmem:[#allocation2 + $0x78] sm:$0xff]  ;;  %p2214_p0 = pnand %p2213_p13, %p2209_p7 }
 0x1e2   : > { %1986 = vmatpush.xpose.msk.msrb.mxu3 %vm1039_vm1, %v1259_v18  ;;  %v1283_v19 = vmul.f32 %v1259_v18, %v1259_v18 }
 0x1e4   : > { %v1329_v21 = vsel %vm1039_vm1, %v1283_v19, 0.0 }
 0x1e5   : > { %1330 = vadd.xlane.f32.xlu0 %v1329_v21 }
 0x1e6   : > { %1987 = vmatpush.xpose.msk.msrb.mxu3 %vm1039_vm1, %v1258_v14 }
 0x1ea   : > { %1988 = vmatpush.xpose.msk.msrb.mxu3 %vm1039_vm1, %v1257_v8 }
 0x1ee   : > { %1989 = vmatpush.xpose.msk.msrb.mxu3 %vm1039_vm1, %v1256_v3 }
 0x1f0   : > { %v1292_v33 = vpop.xlane.xlu1 %1291 }
 0x1f2   : > { %1990 = vmatpush.xpose.msk.msrb.mxu3 %vm1039_vm1, %v1255_v61 }
 0x1f6   : > { %1991 = vmatpush.xpose.msk.msrb.mxu3 %vm1039_vm1, %v1254_v56 }
 0x1f7   : > { %v1239_v22 = vpop.f32.mrf.mxu3 }
 0x1f8   : > { %v1240_v24 = vadd.f32 %v2147_v23, %v1239_v22  ;;  %v1295_v35 = vpop.xlane.xlu1 %1294 }
 0x1fa   : > { %v1260_v25 = vmul.f32 %v1240_v24, %v1240_v24  ;;  %1992 = vmatpush.xpose.msk.msrb.mxu3 %vm1039_vm1, %v1253_v51 }
 0x1fc   : > { %v1262_v27 = vsel %vm1039_vm1, %v1260_v25, 0.0 }
 0x1fd   : > { %1263 = vadd.xlane.f32.xlu1 %v1262_v27 }
 0x1fe   : > { %1993 = vmatpush.xpose.msk.msrb.mxu3 %vm1039_vm1, %v2716_v46 }
 0x1ff   : > { %v1241_v28 = vpop.f32.mrf.mxu3 }
 0x200   : > { %v1242_v29 = vadd.f32 %v2147_v23, %v1241_v28  ;;  %v1298_v34 = vpop.xlane.xlu2 %1297 }
 0x202   : > { %v1261_v30 = vmul.f32 %v1242_v29, %v1242_v29  ;;  %1994 = vmatpush.xpose.msk.msrb.mxu3 %vm1039_vm1, %v2709_v41 }
 0x204   : > { %v1265_v32 = vsel %vm1039_vm1, %v1261_v30, 0.0 }
 0x205   : > { %1266 = vadd.xlane.f32.xlu2 %v1265_v32 }
 0x206   : > { %1995 = vmatpush.xpose.msk.msrb.mxu3 %vm1039_vm1, %v2702_v36 }
 0x208   : > { %v1301_v36 = vpop.xlane.xlu2 %1300 }
 0x20a   : > { %1996 = vmatpush.xpose.msk.msrb.mxu3 %vm1039_vm1, %v2695_v31  ;;  %v1286_v31 = vpop.xlane.xlu0 %1285 }
 0x20e   : > { %1997 = vmatpush.xpose.msk.msrb.mxu3 %vm1039_vm1, %v2688_v26 }
 0x212   : > { %1998 = vmatpush.xpose.msk.msrb.mxu3 %vm1039_vm1, %v2681_v20  ;;  %v1289_v26 = vpop.xlane.xlu0 %1288 }
 0x216   : > { %1999 = vmatpush.xpose.msk.msrb.mxu3 %vm1039_vm1, %v2674_v15  ;;  %v1426_v15 = vand.u32 127, %v1425_v37 }
 0x218   : > { %v1307_v38 = vpop.xlane.xlu1 %1306  ;;  %v1432_v41 = vadd.s32 4294967280, %v1426_v15  ;;  %v1436_v42 = vadd.s32 4294967272, %v1426_v15  ;;  %v1444_v44 = vadd.s32 4294967256, %v1426_v15  ;;  %v1448_v47 = vadd.s32 4294967248, %v1426_v15 }
 0x219   : > { %v1427_v48 = vperm.slane %v1286_v31, %v1426_v15  ;;  %v1452_v50 = vadd.s32 4294967240, %v1426_v15  ;;  %v1456_v53 = vadd.s32 4294967232, %v1426_v15  ;;  %v1460_v57 = vadd.s32 4294967224, %v1426_v15 }
 0x21a   : > { %2000 = vmatpush.xpose.msk.msrb.mxu3 %vm1039_vm1, %v2666_v10  ;;  %v1304_v20 = vpop.xlane.xlu0 %1303  ;;  %v1428_v10 = vadd.s32 4294967288, %v1426_v15  ;;  %v1433_v46 = vperm.slane %v1292_v33, %v1432_v41  ;;  %v1437_v49 = vperm.slane %v1295_v35, %v1436_v42  ;;  %v1445_v56 = vperm.slane %v1301_v36, %v1444_v44 }
 0x21b   : > { %v1449_v59 = vperm.slane %v1304_v20, %v1448_v47  ;;  %v1464_v60 = vadd.s32 4294967216, %v1426_v15  ;;  %v1453_v62 = vperm.slane %v1307_v38, %v1452_v50  ;;  %v1468_v63 = vadd.s32 4294967208, %v1426_v15 }
 0x21c   : > { %v1429_v43 = vperm.slane %v1289_v26, %v1428_v10  ;;  %v1472_v3 = vadd.s32 4294967200, %v1426_v15  ;;  %v1476_v6 = vadd.s32 4294967192, %v1426_v15  ;;  %v1480_v11 = vadd.s32 4294967184, %v1426_v15 }
 0x21d   : > { %v1484_v16 = vadd.s32 4294967176, %v1426_v15  ;;  %v2308_v44 = vmov 0  }
 0x21e   : > { %2001 = vmatpush.xpose.msk.msrb.mxu3 %vm1039_vm1, %v2659_v0  ;;  %v1440_v0 = vadd.s32 4294967264, %v1426_v15  ;;  %v1431_v55 = vsel %vm1430_vm2, %v1429_v43, %v1427_v48 }
 0x21f   : > { %v1435_v58 = vsel %vm1434_vm3, %v1433_v46, %v1431_v55 }
 0x220   : > { %v1310_v39 = vpop.xlane.xlu2 %1309  ;;  %v1441_v52 = vperm.slane %v1298_v34, %v1440_v0  ;;  %v1439_v61 = vsel %vm1438_vm4, %v1437_v49, %v1435_v58 }
 0x221   : > { %2002 = vmatmul.msk.f32.vlgmr.msrb.gmra.mxu3 %vm1039_vm1, %v1240_v24  ;;  %v1457_v2 = vperm.slane %v1310_v39, %v1456_v53 }
 0x222   : > { %v1443_v1 = vsel %vm1442_vm5, %v1441_v52, %v1439_v61 }
 0x223   : > { %v1447_v4 = vsel %vm1446_vm6, %v1445_v56, %v1443_v1 }
 0x224   : > { %v1451_v8 = vsel %vm1450_vm7, %v1449_v59, %v1447_v4 }
 0x225   : > { %v1455_v12 = vsel %vm1454_vm8, %v1453_v62, %v1451_v8 }
 0x226   : > { %v1459_v17 = vsel %vm1458_vm9, %v1457_v2, %v1455_v12 }
 0x228   : > { %v1313_v40 = vpop.xlane.xlu0 %1312 }
 0x229   : > { %2003 = vmatmul.msk.f32.gmra.mxu3 %vm1039_vm1, %v1242_v29  ;;  %v1461_v5 = vperm.slane %v1313_v40, %v1460_v57  ;;  %v1533_v40 = vld [vmem:[%s564_s19] sm:$0x1] }
 0x22a   : > { %vm1534_vm1 = vcmp.ne.s32.totalorder %v1533_v40, 0 }
 0x22b   : > { %v1463_v21 = vsel %vm1462_vm10, %v1461_v5, %v1459_v17 }
 0x230   : > { %v1316_v45 = vpop.xlane.xlu1 %1315 }
 0x231   : > { %v1465_v9 = vperm.slane %v1316_v45, %v1464_v60  ;;  %v1535_v45 = vsel %vm1534_vm1, 1, %v2308_v44 }
 0x232   : > { %v1536_v48 = vperm.slane %v1535_v45, 0 }
 0x233   : > { %v1467_v22 = vsel %vm1466_vm11, %v1465_v9, %v1463_v21 }
 0x234   : > { %vm2778_vm3 = vcmp.eq.s32.totalorder %v1536_v48, 1 }
 0x238   : > { %v1319_v51 = vpop.xlane.xlu2 %1318 }
 0x239   : > { %v1469_v13 = vperm.slane %v1319_v51, %v1468_v63 }
 0x23b   : > { %v1471_v25 = vsel %vm1470_vm12, %v1469_v13, %v1467_v22 }
 0x240   : > { %v1322_v54 = vpop.xlane.xlu0 %1321 }
 0x241   : > { %v1473_v18 = vperm.slane %v1322_v54, %v1472_v3 }
 0x243   : > { %v1475_v28 = vsel %vm1474_vm13, %v1473_v18, %v1471_v25 }
 0x248   : > { %v1325_v7 = vpop.xlane.xlu1 %1324 }
 0x249   : > { %v1477_v23 = vperm.slane %v1325_v7, %v1476_v6 }
 0x24b   : > { %v1479_v29 = vsel %vm1478_vm14, %v1477_v23, %v1475_v28 }
 0x250   : > { %v1328_v14 = vpop.xlane.xlu2 %1327 }
 0x251   : > { %v1481_v24 = vperm.slane %v1328_v14, %v1480_v11 }
 0x253   : > { %v1483_v32 = vsel %vm1482_vm15, %v1481_v24, %v1479_v29 }
 0x258   : > { %v1331_v19 = vpop.xlane.xlu0 %1330 }
 0x259   : > { %v1485_v27 = vperm.slane %v1331_v19, %v1484_v16 }
 0x25b   : > { %v1487_v31 = vsel %vm1486_vm0, %v1485_v27, %v1483_v32 }
 0x270   : > { %v1264_v30 = vpop.xlane.xlu1 %1263 }
 0x271   : > { %v1501_v34 = vadd.f32 %v1487_v31, %v1264_v30 }
 0x278   : > { %v1267_v20 = vpop.xlane.xlu2 %1266 }
 0x279   : > { %v1502_v38 = vadd.f32 %v1487_v31, %v1267_v20 }
 0x2a4   : > { %v1403_v33 = vpop.f32.mrf.mxu3 }
 0x2a5   : > { %v1503_v26 = vmul.f32 2.0, %v1403_v33 }
 0x2a7   : > { %v1505_v35 = vsub.f32 %v1501_v34, %v1503_v26 }
 0x2a9   : > { %v1507_v36 = vmax.f32 %v1505_v35, 0.0 }
 0x2ab   : > { %2148 = vrsqrt.f32 %v1507_v36  ;;  %vm1516_vm2 = vcmp.eq.f32.partialorder %v1507_v36, inf  ;;  %v1519_v53 = vand.u32 2147483648, %v1507_v36  ;;  %vm1518_vm4 = vcmp.eq.f32.partialorder %v1507_v36, 0.0 }
 0x2ac   : > { %v1406_v37 = vpop.f32.mrf.mxu3 }
 0x2ad   : > { %v1504_v15 = vmul.f32 2.0, %v1406_v37 }
 0x2af   : > { %v1506_v39 = vsub.f32 %v1502_v38, %v1504_v15 }
 0x2b1   : > { %v2149_v10 = vpop.eup %2148  ;;  %v1508_v41 = vmax.f32 %v1506_v39, 0.0 }
 0x2b2   : > { %v1510_v42 = vmul.f32 %v2149_v10, %v1507_v36 }
 0x2b3   : > { %2150 = vrsqrt.f32 %v1508_v41  ;;  %vm1528_vm5 = vcmp.eq.f32.partialorder %v1508_v41, inf  ;;  %v1531_v62 = vand.u32 2147483648, %v1508_v41  ;;  %vm1530_vm6 = vcmp.eq.f32.partialorder %v1508_v41, 0.0 }
 0x2b4   : > { %v1511_v0 = vmul.f32 %v2149_v10, %v1510_v42 }
 0x2b6   : > { %v1512_v43 = vmul.f32 0.5, %v1511_v0 }
 0x2b8   : > { %v1513_v46 = vsub.f32 1.5, %v1512_v43 }
 0x2b9   : > { %v2151_v47 = vpop.eup %2150 }
 0x2ba   : > { %v1514_v49 = vmul.f32 %v2149_v10, %v1513_v46  ;;  %v1522_v50 = vmul.f32 %v2151_v47, %v1508_v41 }
 0x2bc   : > { %v1515_v51 = vmul.f32 %v1514_v49, %v1507_v36  ;;  %v1523_v52 = vmul.f32 %v2151_v47, %v1522_v50 }
 0x2be   : > { %v1517_v55 = vsel %vm1516_vm2, %v1507_v36, %v1515_v51  ;;  %v1524_v56 = vmul.f32 0.5, %v1523_v52 }
 0x2bf   : > { %v1520_v57 = vsel %vm1518_vm4, %v1519_v53, %v1517_v55 }
 0x2c0   : > { %v1538_v58 = vsel %vm2778_vm3, %v1520_v57, -3.4028235e+38  ;;  %v1525_v59 = vsub.f32 1.5, %v1524_v56 }
 0x2c1   : > { %1540 = vmax.xlane.f32.xlu0 %v1538_v58  ;;  %1558 = vst [vmem:[%s551_s22] sm:$0xff] %v1538_v58 }
 0x2c2   : > { %v1526_v60 = vmul.f32 %v2151_v47, %v1525_v59 }
 0x2c4   : > { %v1527_v61 = vmul.f32 %v1526_v60, %v1508_v41 }
 0x2c6   : > { %v1529_v63 = vsel %vm1528_vm5, %v1508_v41, %v1527_v61 }
 0x2c7   : > { %v1532_v1 = vsel %vm1530_vm6, %v1531_v62, %v1529_v63 }
 0x2c8   : > { %v1539_v2 = vsel %vm2778_vm3, %v1532_v1, -3.4028235e+38 }
 0x2c9   : > { %1542 = vmax.xlane.f32.xlu1 %v1539_v2  ;;  %1559 = vst [vmem:[%s551_s22 + $0x8] sm:$0xff] %v1539_v2 }
 0x334   : > { %v1541_v3 = vpop.xlane.xlu0 %1540 }
 0x335   : > { %v1544_v4 = vsub.f32 %v1538_v58, %v1541_v3 }
 0x337   : > { %v1546_v5 = vmul.f32 1.442695, %v1544_v4 }
 0x339   : > { %2152 = vpow2.f32 %v1546_v5 }
 0x33c   : > { %v1543_v6 = vpop.xlane.xlu1 %1542 }
 0x33d   : > { %v1545_v7 = vsub.f32 %v1539_v2, %v1543_v6 }
 0x33f   : > { %v2153_v8 = vpop.eup %2152  ;;  %v1548_v9 = vmul.f32 1.442695, %v1545_v7 }
 0x340   : > { %1550 = vadd.xlane.f32.xlu2 %v2153_v8 }
 0x341   : > { %2154 = vpow2.f32 %v1548_v9 }
 0x347   : > { %v2155_v11 = vpop.eup %2154 }
 0x348   : > { %1552 = vadd.xlane.f32.xlu0 %v2155_v11 }
 0x349   : > { %2217 = shalt.err (!%p2214_p0)
}
 0x34a   : > { %s2309_s29 = smov 128   ;;  %s2310_s14 = smov 8  }
 0x34b   : > { %2074 = dma.vmem_to_hbm [thread:$0]  (%p2437_p9), %s1602_s20, 256, %s1604_s21, %s1568_s23, %s2309_s29, %s2309_s29, %s2310_s14  }
 0x34c   : > { %s2898_s0 = sshll.u32 %s2460_s17, 4  ;;  %s2899_s19 = sld [smem:[#allocation21_spill]] }
 0x34d   : > { %s544_s24 = scalar_lea.vmem [#allocation6], %s2898_s0  ;;  %s1563_s20 = scalar_lea.sflag [#allocation5], %s2460_s17 }
 0x34e   : > { %s1582_s13 = sshll.u32 %s544_s24, 4  ;;  %s1583_s13 = int_to_ptr.vmem [resolvable:$true] %s1582_s13 }
 0x352   : > { %s1581_s22 = scalar_lea.hbm %s2899_s19, %s2069_s2  ;;  %s2238_s26 = scalar_lea.hbm %s2899_s19, 32 }
 0x353   : > { %s1584_s1 = sshll.u32 %s1581_s22, 4  ;;  %s1585_s1 = int_to_ptr.hbm [resolvable:$true] %s1584_s1 }
 0x354   : > { %s2232_s21 = sshra.s32 %s1585_s1, 4  ;;  %s2233_s21 = int_to_ptr.hbm [resolvable:$true] %s2232_s21 }
 0x355   : > { %s2234_s23 = scalar_lea.hbm %s2233_s21, 16  ;;  %p2239_p4 = scmp.lt.s32.totalorder %s2233_s21, %s2899_s19 }
 0x356   : > { %p2235_p1 = scmp.ne.s32.totalorder %s2233_s21, %s2234_s23  ;;  %p2240_p5 = scmp.lt.s32.totalorder %s2238_s26, %s2234_s23 }
 0x358   : > { %p2236_p2 = pnand %p2235_p1, %p2437_p9  ;;  %p2241_p6 = por %p2240_p5, %p2239_p4 }
 0x35a   : > { %p2237_p3 = pneg %p2236_p2 }
 0x35c   : > { %p2242_p7 = pnand %p2241_p6, %p2237_p3 }
 0x3b3   : > { %v1551_v12 = vpop.xlane.xlu2 %1550 }
 0x3b4   : > { %2156 = vrcp.f32 %v1551_v12 }
 0x3ba   : > { %v2157_v13 = vpop.eup %2156 }
 0x3bb   : > { %v1556_v14 = vmul.f32 %v2157_v13, %v2153_v8  ;;  %v1553_v16 = vpop.xlane.xlu0 %1552 }
 0x3bc   : > { %2158 = vrcp.f32 %v1553_v16 }
 0x3bd   : > { %1560 = vst [vmem:[%s544_s24] sm:$0xff] %v1556_v14 }
 0x3c2   : > { %v2159_v17 = vpop.eup %2158 }
 0x3c3   : > { %v1557_v18 = vmul.f32 %v2159_v17, %v2155_v11 }
 0x3c5   : > { %1561 = vst [vmem:[%s544_s24 + $0x8] sm:$0xff] %v1557_v18 }
 0x3c6   : > { %2245 = shalt.err (!%p2242_p7)
}
 0x3c7   : > { %2073 = dma.vmem_to_hbm [thread:$0]  (%p2437_p9), %s1583_s13, 256, %s1585_s1, %s1563_s20, %s2309_s29, %s2309_s29, %s2310_s14  }
 0x3c8 PF: > { %s2900_s17 = sld [smem:[#allocation12_spill]]  ;;  %p2082_p8 = pnand %p1754_p12, %p2444_p11 }
 0x3ca   : > { %p2083_p10 = pneg %p2082_p8 }
 0x3ce   : > { %s1618_s24 = sand.u32 1, %s2900_s17  }
 0x3cf   : > { %s1619_s22 = scalar_lea.sflag [#allocation5], %s1618_s24 }
 0x3d0   : > { %2275 = dma.done.wait (%p2083_p10), %s1619_s22, 256  }
 0x3d1   : > { %2277 = vsyncadd (%p2083_p10), %s1619_s22, 4294967040  ;;  %s1629_s21 = scalar_lea.sflag [#allocation8], %s1618_s24 }
 0x3d2   : > { %2279 = dma.done.wait (%p2083_p10), %s1629_s21, 256  }
 0x3d3   : > { %2281 = vsyncadd (%p2083_p10), %s1629_s21, 4294967040  ;;  %s34_s18 = sadd.s32 1, %s2304_s18   ;;  %s2901_s1 = sld [smem:[#allocation16_spill]] }
 0x3d4   : > { %p31_p13 = scmp.ge.s32.totalorder %s34_s18, 4   ;;  %s2902_s16 = sld [smem:[#allocation13_spill]] }
 0x3d5   : > { %s2903_s17 = sld [smem:[#allocation14_spill]]  ;;  %s2904_s29 = smov %s2288_s30 }
 0x3d6   : > { %s2905_s30 = smov %s2292_s15  ;;  %33 = sbr.rel (!%p31_p13) target bundleno = 15 (0xf), region = 144 }
 0x3d9   : > { %s2906_s15 = smov %s2901_s1 }
 0x3db   :  { %1635 = vsyncpa [#allocation4], 1 }
 0x3dc   :  { %1637 = vsyncpa [#allocation4 + $0x1], 1 }
 0x3dd   :  { %1638 = vsyncpa [#allocation5], 1 }
 0x3de   :  { %1640 = vsyncpa [#allocation5 + $0x1], 1 }
 0x3df   :  { %1641 = vsyncpa [#allocation8], 1 }
 0x3e0   :  { %1643 = vsyncpa [#allocation8 + $0x1], 1 }

</bundles_post_ra>
